<compile_context>
chip_gen: v5e
topology: v5e:2x2
jax: 0.10.0
libtpu: 0.0.40
codegen_flags: <defaults>
</compile_context>

<pallas_src>
import math

import jax
import jax.numpy as jnp
import numpy as np
from jax.experimental import pallas as pl
from jax.experimental.pallas import tpu as pltpu

# ----------------------------- configuration --------------------------------
NUM_USERS = 10
NUM_ITEMS = 50
HIDDEN = 32          # real hidden size H
MAX_LEN = 8
NUM_HEADS = 2
NUM_BLOCKS = 2
DROPOUT = 0.0        # eval mode: all nn.Dropout layers are identity

B = 2                # batch
S = MAX_LEN          # sequence length
H = HIDDEN
HP = 128             # lane-padded hidden (f32 vreg is 8 x 128)
HD = H // NUM_HEADS  # real head dim
L = NUM_BLOCKS


# ------------------------------ kernel --------------------------------------
def make_sasrec_kernel(num_blocks, num_heads, h_real, hp, seq_len):
    hd = h_real // num_heads
    scale = 1.0 / math.sqrt(hd)
    inv_h = 1.0 / h_real
    eps = 1e-8

    def kernel(seqs_ref, tmask_ref, pn_ref,
               aln_g_ref, aln_b_ref,
               wqT_ref, bq_ref, wkvT_ref, bkv_ref, woT_ref, bo_ref,
               fln_g_ref, fln_b_ref,
               c1wT_ref, c1b_ref, c2wT_ref, c2b_ref,
               lln_g_ref, lln_b_ref,
               out_ref):
        # one batch element per grid program
        x = seqs_ref[0]        # (S, HP)  scaled + pos-embedded + timeline-masked, lane-padded
        tm = tmask_ref[0]      # (S, HP)  timeline mask broadcast over lanes

        # ---- hoisted constants (built once, outside the block loop) ----
        lane = jax.lax.broadcasted_iota(jnp.int32, (1, hp), 1)
        lane_mask = (lane < h_real).astype(jnp.float32)                        # (1, HP)
        head_masks = [((lane >= h * hd) & (lane < (h + 1) * hd)).astype(jnp.float32)
                      for h in range(num_heads)]                               # each (1, HP)
        row_t = jax.lax.broadcasted_iota(jnp.int32, (num_heads * seq_len, seq_len), 0)
        col_t = jax.lax.broadcasted_iota(jnp.int32, (num_heads * seq_len, seq_len), 1)
        causal_t = col_t <= (row_t % seq_len)                                  # (nh*S, S)

        def layernorm(z, g, b):
            # LayerNorm over the REAL hidden width (padded lanes are zero on input and
            # stay zero on output because gamma/beta are zero-padded).
            mu = jnp.sum(z, axis=-1, keepdims=True) * inv_h
            zc = (z - mu) * lane_mask
            var = jnp.sum(zc * zc, axis=-1, keepdims=True) * inv_h
            return zc * jax.lax.rsqrt(var + eps) * g[None, :] + b[None, :]

        for i in range(num_blocks):
            # ---- multi-head self attention (query is LayerNormed, K/V are not) ----
            q_in = layernorm(x, aln_g_ref[i], aln_b_ref[i])                    # (S, HP)
            q = jnp.dot(q_in, wqT_ref[i],
                        preferred_element_type=jnp.float32) + bq_ref[i][None, :]
            kv = jnp.dot(x, wkvT_ref[i],
                         preferred_element_type=jnp.float32) + bkv_ref[i][None, :]  # (S, 2HP)
            k = kv[:, :hp]                                                     # lane-group aligned
            v = kv[:, hp:]

            # stack per-head lane-masked queries/values along sublanes:
            #   qm[h*S + t] = q[t] * head_mask_h,  vm[h*S + t] = v[t] * head_mask_h
            qm = jnp.concatenate([q * head_masks[h] for h in range(num_heads)], axis=0)
            vm = jnp.concatenate([v * head_masks[h] for h in range(num_heads)], axis=0)

            # one score matmul for all heads: s[h*S+q, k] = <q_h[q], k_h[k]> / sqrt(hd)
            s = jnp.einsum('qc,kc->qk', qm, k,
                           preferred_element_type=jnp.float32) * scale          # (nh*S, S)
            s = jnp.where(causal_t, s, -1e30)
            s = s - jnp.max(s, axis=-1, keepdims=True)
            e = jnp.exp(s)
            p = e * pl.reciprocal(jnp.sum(e, axis=-1, keepdims=True), approx=True)

            # one value matmul for all heads:
            #   o = sum_h p_h @ (v * head_mask_h)  ==  [p_0 | p_1 | ...] @ vm
            pm = jnp.concatenate([p[h * seq_len:(h + 1) * seq_len]
                                  for h in range(num_heads)], axis=1)            # (S, nh*S)
            o = jnp.dot(pm, vm, preferred_element_type=jnp.float32)             # (S, HP)

            mha = jnp.dot(o, woT_ref[i],
                          preferred_element_type=jnp.float32) + bo_ref[i][None, :]
            x = q_in + mha   # residual off the LayerNormed query (as in the reference)

            # ---- point-wise feed forward (Conv1d k=1 -> ReLU -> Conv1d k=1) ----
            xf = layernorm(x, fln_g_ref[i], fln_b_ref[i])
            h1 = jnp.dot(xf, c1wT_ref[i],
                         preferred_element_type=jnp.float32) + c1b_ref[i][None, :]
            h1 = jnp.maximum(h1, 0.0)
            y = jnp.dot(h1, c2wT_ref[i],
                        preferred_element_type=jnp.float32) + c2b_ref[i][None, :]
            x = (xf + y) * tm   # timeline mask after each block

        log_feats = layernorm(x, lln_g_ref[0], lln_b_ref[0])                    # (S, HP)

        # packed pos/neg logits in a single reduction pass
        pn = pn_ref[0]                                                          # (2, S, HP)
        out_ref[0] = jnp.sum(log_feats[None, :, :] * pn, axis=-1)               # (2, S)

    return kernel


# ------------------------------ pallas wrapper --------------------------------
def _full_spec(shape):
    return pl.BlockSpec(shape, lambda b: (0,) * len(shape))


_sasrec_call = pl.pallas_call(
    make_sasrec_kernel(NUM_BLOCKS, NUM_HEADS, H, HP, S),
    out_shape=jax.ShapeDtypeStruct((B, 2, S), jnp.float32),
    grid=(B,),
    in_specs=[
        pl.BlockSpec((1, S, HP), lambda b: (b, 0, 0)),        # seqs (lane-padded)
        pl.BlockSpec((1, S, HP), lambda b: (b, 0, 0)),        # timeline mask
        pl.BlockSpec((1, 2, S, HP), lambda b: (b, 0, 0, 0)),  # stacked pos/neg embeddings
        _full_spec((L, HP)), _full_spec((L, HP)),             # attn LN gamma/beta
        _full_spec((L, HP, HP)), _full_spec((L, HP)),         # WqT, bq
        _full_spec((L, HP, 2 * HP)), _full_spec((L, 2 * HP)), # fused WkvT, bkv
        _full_spec((L, HP, HP)), _full_spec((L, HP)),         # WoT, bo
        _full_spec((L, HP)), _full_spec((L, HP)),             # ffn LN gamma/beta
        _full_spec((L, HP, HP)), _full_spec((L, HP)),         # conv1.T, b1
        _full_spec((L, HP, HP)), _full_spec((L, HP)),         # conv2.T, b2
        _full_spec((1, HP)), _full_spec((1, HP)),             # last LN gamma/beta
    ],
    out_specs=pl.BlockSpec((1, 2, S), lambda b: (b, 0, 0)),
    compiler_params=pltpu.CompilerParams(
        dimension_semantics=("parallel",),      # v7x: shard batch across both TensorCores
        vmem_limit_bytes=32 * 1024 * 1024,      # explicit budget (safe on v7x's 64 MiB VMEM)
    ),
)


def prepare_weights(params):
    """Zero-pad the hidden dim to HP lanes and pre-transpose so the kernel does x @ W."""
    def pad_cols(a):  # (..., n) -> (..., HP)
        return jnp.pad(a, [(0, 0)] * (a.ndim - 1) + [(0, HP - a.shape[-1])])

    def padT(w):      # (L, out, in) -> (L, HP, HP) transposed (real block top-left)
        wt = jnp.transpose(w, (0, 2, 1))
        return jnp.pad(wt, ((0, 0), (0, HP - wt.shape[1]), (0, HP - wt.shape[2])))

    inw, inb = params['inw'], params['inb']                    # (L, 3H, H), (L, 3H)
    wq, wk, wv = inw[:, :H], inw[:, H:2 * H], inw[:, 2 * H:]
    bq, bk, bv = inb[:, :H], inb[:, H:2 * H], inb[:, 2 * H:]

    # fused K/V projection: K lands in output lanes [0, HP), V in [HP, 2*HP)
    wkvT = jnp.zeros((L, HP, 2 * HP), jnp.float32)
    wkvT = wkvT.at[:, :H, :H].set(jnp.transpose(wk, (0, 2, 1)))
    wkvT = wkvT.at[:, :H, HP:HP + H].set(jnp.transpose(wv, (0, 2, 1)))
    bkv = jnp.zeros((L, 2 * HP), jnp.float32)
    bkv = bkv.at[:, :H].set(bk).at[:, HP:HP + H].set(bv)

    return (
        pad_cols(params['aln_g']), pad_cols(params['aln_b']),
        padT(wq), pad_cols(bq),
        wkvT, bkv,
        padT(params['outw']), pad_cols(params['outb']),
        pad_cols(params['fln_g']), pad_cols(params['fln_b']),
        padT(params['c1w']), pad_cols(params['c1b']),
        padT(params['c2w']), pad_cols(params['c2b']),
        pad_cols(params['lln_g']), pad_cols(params['lln_b']),
    )


@jax.jit
def sasrec_forward(params, log_seqs, pos_seqs, neg_seqs):
    """Equivalent of SASRec.forward (eval mode). Returns (pos_logits, neg_logits)."""
    item_emb = params['item_emb']
    # glue (plain JAX): embedding gathers + positional embedding + scaling/masking + padding.
    # TODO(synk): at realistic batch/seq sizes, move the gathers into the kernel via
    # PrefetchScalarGridSpec scalar-prefetched indices + DMA from item_emb in pl.ANY.
    seqs = item_emb[log_seqs] * (H ** 0.5)
    seqs = seqs + params['pos_emb'][jnp.arange(log_seqs.shape[1])][None, :, :]
    tmask = (log_seqs != 0).astype(jnp.float32)[..., None]               # (B, S, 1)
    seqs = (seqs * tmask).astype(jnp.float32)
    seqs_p = jnp.pad(seqs, ((0, 0), (0, 0), (0, HP - H)))                # (B, S, HP)
    tmask_p = jnp.broadcast_to(tmask, (B, S, HP)).astype(jnp.float32)    # (B, S, HP)
    pn = jnp.stack([item_emb[pos_seqs], item_emb[neg_seqs]], axis=1).astype(jnp.float32)
    pn_p = jnp.pad(pn, ((0, 0), (0, 0), (0, 0), (0, HP - H)))            # (B, 2, S, HP)

    w = prepare_weights(params)
    out = _sasrec_call(seqs_p, tmask_p, pn_p, *w)                        # (B, 2, S)
    return out[:, 0, :], out[:, 1, :]


# ------------------------------ pure-JAX reference ----------------------------
def sasrec_reference(params, log_seqs, pos_seqs, neg_seqs):
    item_emb = params['item_emb']
    seqs = item_emb[log_seqs] * (H ** 0.5)
    seqs = seqs + params['pos_emb'][jnp.arange(log_seqs.shape[1])][None, :, :]
    tmask = (log_seqs != 0).astype(jnp.float32)[..., None]
    seqs = seqs * tmask

    def ln(x, g, b, eps=1e-8):
        mu = x.mean(-1, keepdims=True)
        var = ((x - mu) ** 2).mean(-1, keepdims=True)
        return (x - mu) / jnp.sqrt(var + eps) * g + b

    causal = jnp.tril(jnp.ones((S, S), bool))[None, None]
    hd = H // NUM_HEADS
    for i in range(NUM_BLOCKS):
        Wi, bi = params['inw'][i], params['inb'][i]
        Wo, bo = params['outw'][i], params['outb'][i]
        Q = ln(seqs, params['aln_g'][i], params['aln_b'][i])
        q = Q @ Wi[:H].T + bi[:H]
        k = seqs @ Wi[H:2 * H].T + bi[H:2 * H]
        v = seqs @ Wi[2 * H:].T + bi[2 * H:]
        q = q.reshape(B, S, NUM_HEADS, hd).transpose(0, 2, 1, 3)
        k = k.reshape(B, S, NUM_HEADS, hd).transpose(0, 2, 1, 3)
        v = v.reshape(B, S, NUM_HEADS, hd).transpose(0, 2, 1, 3)
        s = (q @ k.transpose(0, 1, 3, 2)) / math.sqrt(hd)
        s = jnp.where(causal, s, -1e30)
        p = jax.nn.softmax(s, axis=-1)
        o = (p @ v).transpose(0, 2, 1, 3).reshape(B, S, H)
        mha = o @ Wo.T + bo
        seqs = Q + mha
        x = ln(seqs, params['fln_g'][i], params['fln_b'][i])
        y = jnp.maximum(x @ params['c1w'][i].T + params['c1b'][i], 0.0)
        y = y @ params['c2w'][i].T + params['c2b'][i]
        seqs = (x + y) * tmask
    log_feats = ln(seqs, params['lln_g'][0], params['lln_b'][0])
    pos_logits = (log_feats * item_emb[pos_seqs]).sum(-1)
    neg_logits = (log_feats * item_emb[neg_seqs]).sum(-1)
    return pos_logits, neg_logits


# ------------------------------ parameter init --------------------------------
def init_params(key):
    ks = jax.random.split(key, 16)

    def nrm(k, shape, s=0.1):
        return jax.random.normal(k, shape, jnp.float32) * s

    item_emb = nrm(ks[0], (NUM_ITEMS + 1, H), 0.5)
    item_emb = item_emb.at[0].set(0.0)  # padding_idx=0
    return dict(
        item_emb=item_emb,
        pos_emb=nrm(ks[1], (MAX_LEN, H), 0.5),
        aln_g=1.0 + nrm(ks[2], (L, H), 0.05),
        aln_b=nrm(ks[3], (L, H), 0.02),
        inw=nrm(ks[4], (L, 3 * H, H)),
        inb=nrm(ks[5], (L, 3 * H), 0.02),
        outw=nrm(ks[6], (L, H, H)),
        outb=nrm(ks[7], (L, H), 0.02),
        fln_g=1.0 + nrm(ks[8], (L, H), 0.05),
        fln_b=nrm(ks[9], (L, H), 0.02),
        c1w=nrm(ks[10], (L, H, H)),
        c1b=nrm(ks[11], (L, H), 0.02),
        c2w=nrm(ks[12], (L, H, H)),
        c2b=nrm(ks[13], (L, H), 0.02),
        lln_g=1.0 + nrm(ks[14], (1, H), 0.05),
        lln_b=nrm(ks[15], (1, H), 0.02),
    )


# ----------------------------------- main --------------------------------------
if __name__ == "__main__":
    key = jax.random.PRNGKey(0)
    kp, k1, k2, k3 = jax.random.split(key, 4)

    params = init_params(kp)

    log_seqs = jax.random.randint(k1, (B, S), 0, NUM_ITEMS + 1, dtype=jnp.int32)
    log_seqs = log_seqs.at[0, 0].set(0)  # exercise padding / timeline mask
    pos_seqs = jax.random.randint(k2, (B, S), 1, NUM_ITEMS + 1, dtype=jnp.int32)
    neg_seqs = jax.random.randint(k3, (B, S), 1, NUM_ITEMS + 1, dtype=jnp.int32)
    # user_ids are unused in the PyTorch forward pass.

    pos_logits, neg_logits = sasrec_forward(params, log_seqs, pos_seqs, neg_seqs)
    jax.block_until_ready((pos_logits, neg_logits))

    ref_pos, ref_neg = sasrec_reference(params, log_seqs, pos_seqs, neg_seqs)
    np.testing.assert_allclose(np.asarray(pos_logits), np.asarray(ref_pos),
                               rtol=5e-3, atol=5e-3)
    np.testing.assert_allclose(np.asarray(neg_logits), np.asarray(ref_neg),
                               rtol=5e-3, atol=5e-3)

    print("KERNEL_OK")
</pallas_src>

<mosaic_0001>
module attributes {stable_mosaic.version = 11 : i64} {
  func.func @kernel(%arg0: i32, %arg1: memref<1x8x128xf32, #tpu.memory_space<vmem>>, %arg2: memref<1x8x128xf32, #tpu.memory_space<vmem>>, %arg3: memref<1x2x8x128xf32, #tpu.memory_space<vmem>>, %arg4: memref<2x128xf32, #tpu.memory_space<vmem>>, %arg5: memref<2x128xf32, #tpu.memory_space<vmem>>, %arg6: memref<2x128x128xf32, #tpu.memory_space<vmem>>, %arg7: memref<2x128xf32, #tpu.memory_space<vmem>>, %arg8: memref<2x128x256xf32, #tpu.memory_space<vmem>>, %arg9: memref<2x256xf32, #tpu.memory_space<vmem>>, %arg10: memref<2x128x128xf32, #tpu.memory_space<vmem>>, %arg11: memref<2x128xf32, #tpu.memory_space<vmem>>, %arg12: memref<2x128xf32, #tpu.memory_space<vmem>>, %arg13: memref<2x128xf32, #tpu.memory_space<vmem>>, %arg14: memref<2x128x128xf32, #tpu.memory_space<vmem>>, %arg15: memref<2x128xf32, #tpu.memory_space<vmem>>, %arg16: memref<2x128x128xf32, #tpu.memory_space<vmem>>, %arg17: memref<2x128xf32, #tpu.memory_space<vmem>>, %arg18: memref<1x128xf32, #tpu.memory_space<vmem>>, %arg19: memref<1x128xf32, #tpu.memory_space<vmem>>, %arg20: memref<1x2x8xf32, #tpu.memory_space<vmem>>) attributes {dimension_semantics = [#tpu.dimension_semantics<parallel>], iteration_bounds = array<i64: 2>, scalar_prefetch = 0 : i64, scratch_operands = 0 : i64, tpu.core_type = #tpu.core_type<tc>, window_params = [{transform_indices = @transform_0, window_bounds = array<i64: 1, 8, 128>}, {transform_indices = @transform_1, window_bounds = array<i64: 1, 8, 128>}, {transform_indices = @transform_2, window_bounds = array<i64: 1, 2, 8, 128>}, {pipeline_mode = #tpu.pipeline_mode<synchronous>, transform_indices = @transform_3, window_bounds = array<i64: 2, 128>}, {pipeline_mode = #tpu.pipeline_mode<synchronous>, transform_indices = @transform_4, window_bounds = array<i64: 2, 128>}, {pipeline_mode = #tpu.pipeline_mode<synchronous>, transform_indices = @transform_5, window_bounds = array<i64: 2, 128, 128>}, {pipeline_mode = #tpu.pipeline_mode<synchronous>, transform_indices = @transform_6, window_bounds = array<i64: 2, 128>}, {pipeline_mode = #tpu.pipeline_mode<synchronous>, transform_indices = @transform_7, window_bounds = array<i64: 2, 128, 256>}, {pipeline_mode = #tpu.pipeline_mode<synchronous>, transform_indices = @transform_8, window_bounds = array<i64: 2, 256>}, {pipeline_mode = #tpu.pipeline_mode<synchronous>, transform_indices = @transform_9, window_bounds = array<i64: 2, 128, 128>}, {pipeline_mode = #tpu.pipeline_mode<synchronous>, transform_indices = @transform_10, window_bounds = array<i64: 2, 128>}, {pipeline_mode = #tpu.pipeline_mode<synchronous>, transform_indices = @transform_11, window_bounds = array<i64: 2, 128>}, {pipeline_mode = #tpu.pipeline_mode<synchronous>, transform_indices = @transform_12, window_bounds = array<i64: 2, 128>}, {pipeline_mode = #tpu.pipeline_mode<synchronous>, transform_indices = @transform_13, window_bounds = array<i64: 2, 128, 128>}, {pipeline_mode = #tpu.pipeline_mode<synchronous>, transform_indices = @transform_14, window_bounds = array<i64: 2, 128>}, {pipeline_mode = #tpu.pipeline_mode<synchronous>, transform_indices = @transform_15, window_bounds = array<i64: 2, 128, 128>}, {pipeline_mode = #tpu.pipeline_mode<synchronous>, transform_indices = @transform_16, window_bounds = array<i64: 2, 128>}, {pipeline_mode = #tpu.pipeline_mode<synchronous>, transform_indices = @transform_17, window_bounds = array<i64: 1, 128>}, {pipeline_mode = #tpu.pipeline_mode<synchronous>, transform_indices = @transform_18, window_bounds = array<i64: 1, 128>}, {transform_indices = @transform_19, window_bounds = array<i64: 1, 2, 8>}]} {
    %c0 = arith.constant 0 : index
    %c0_0 = arith.constant 0 : index
    %c0_1 = arith.constant 0 : index
    %0 = vector.load %arg1[%c0, %c0_0, %c0_1] : memref<1x8x128xf32, #tpu.memory_space<vmem>>, vector<1x8x128xf32>
    %1 = vector.shape_cast %0 : vector<1x8x128xf32> to vector<8x128xf32>
    %c0_2 = arith.constant 0 : index
    %c0_3 = arith.constant 0 : index
    %c0_4 = arith.constant 0 : index
    %2 = vector.load %arg2[%c0_2, %c0_3, %c0_4] : memref<1x8x128xf32, #tpu.memory_space<vmem>>, vector<1x8x128xf32>
    %3 = vector.shape_cast %2 : vector<1x8x128xf32> to vector<8x128xf32>
    %4 = tpu.iota {dimensions = array<i32: 1>} : vector<1x128xi32>
    %c32_i32 = arith.constant 32 : i32
    %5 = vector.broadcast %c32_i32 : i32 to vector<1x128xi32>
    %6 = arith.cmpi slt, %4, %5 : vector<1x128xi32>
    %7 = arith.extui %6 : vector<1x128xi1> to vector<1x128xi32>
    %8 = arith.sitofp %7 : vector<1x128xi32> to vector<1x128xf32>
    %c0_i32 = arith.constant 0 : i32
    %9 = vector.broadcast %c0_i32 : i32 to vector<1x128xi32>
    %10 = arith.cmpi sge, %4, %9 : vector<1x128xi32>
    %c16_i32 = arith.constant 16 : i32
    %11 = vector.broadcast %c16_i32 : i32 to vector<1x128xi32>
    %12 = arith.cmpi slt, %4, %11 : vector<1x128xi32>
    %13 = arith.andi %10, %12 : vector<1x128xi1>
    %14 = arith.extui %13 : vector<1x128xi1> to vector<1x128xi32>
    %15 = arith.sitofp %14 : vector<1x128xi32> to vector<1x128xf32>
    %c16_i32_5 = arith.constant 16 : i32
    %16 = vector.broadcast %c16_i32_5 : i32 to vector<1x128xi32>
    %17 = arith.cmpi sge, %4, %16 : vector<1x128xi32>
    %c32_i32_6 = arith.constant 32 : i32
    %18 = vector.broadcast %c32_i32_6 : i32 to vector<1x128xi32>
    %19 = arith.cmpi slt, %4, %18 : vector<1x128xi32>
    %20 = arith.andi %17, %19 : vector<1x128xi1>
    %21 = arith.extui %20 : vector<1x128xi1> to vector<1x128xi32>
    %22 = arith.sitofp %21 : vector<1x128xi32> to vector<1x128xf32>
    %23 = tpu.iota {dimensions = array<i32: 0>} : vector<16x8xi32>
    %24 = tpu.iota {dimensions = array<i32: 1>} : vector<16x8xi32>
    %c8_i32 = arith.constant 8 : i32
    %c0_i32_7 = arith.constant 0 : i32
    %25 = arith.cmpi eq, %c8_i32, %c0_i32_7 : i32
    %c1_i32 = arith.constant 1 : i32
    %26 = arith.select %25, %c1_i32, %c8_i32 : i32
    %27 = vector.broadcast %26 : i32 to vector<16x8xi32>
    %28 = arith.remsi %23, %27 : vector<16x8xi32>
    %c0_i32_8 = arith.constant 0 : i32
    %29 = vector.broadcast %c0_i32_8 : i32 to vector<16x8xi32>
    %30 = arith.cmpi ne, %28, %29 : vector<16x8xi32>
    %c0_i32_9 = arith.constant 0 : i32
    %31 = vector.broadcast %c0_i32_9 : i32 to vector<16x8xi32>
    %32 = arith.cmpi slt, %28, %31 : vector<16x8xi32>
    %c0_i32_10 = arith.constant 0 : i32
    %33 = arith.cmpi slt, %26, %c0_i32_10 : i32
    %34 = vector.broadcast %33 : i1 to vector<16x8xi1>
    %35 = vector.broadcast %34 : vector<16x8xi1> to vector<16x8xi1>
    %36 = arith.xori %32, %35 : vector<16x8xi1>
    %37 = arith.andi %36, %30 : vector<16x8xi1>
    %38 = vector.broadcast %26 : i32 to vector<16x8xi32>
    %39 = arith.addi %28, %38 : vector<16x8xi32>
    %40 = arith.select %37, %39, %28 : vector<16x8xi1>, vector<16x8xi32>
    %41 = arith.cmpi sle, %24, %40 : vector<16x8xi32>
    %c0_11 = arith.constant 0 : index
    %c0_12 = arith.constant 0 : index
    %42 = vector.load %arg4[%c0_11, %c0_12] : memref<2x128xf32, #tpu.memory_space<vmem>>, vector<1x128xf32>
    %43 = vector.shape_cast %42 : vector<1x128xf32> to vector<128xf32>
    %c0_13 = arith.constant 0 : index
    %c0_14 = arith.constant 0 : index
    %44 = vector.load %arg5[%c0_13, %c0_14] : memref<2x128xf32, #tpu.memory_space<vmem>>, vector<1x128xf32>
    %45 = vector.shape_cast %44 : vector<1x128xf32> to vector<128xf32>
    %cst = arith.constant dense<0.000000e+00> : vector<8xf32>
    %46 = vector.multi_reduction <add>, %1, %cst [1] : vector<8x128xf32> to vector<8xf32>
    %47 = vector.shape_cast %46 : vector<8xf32> to vector<8x1xf32>
    %cst_15 = arith.constant 3.125000e-02 : f32
    %48 = vector.broadcast %cst_15 : f32 to vector<8x1xf32>
    %49 = arith.mulf %47, %48 : vector<8x1xf32>
    %50 = vector.broadcast %49 : vector<8x1xf32> to vector<8x128xf32>
    %51 = arith.subf %1, %50 : vector<8x128xf32>
    %52 = vector.broadcast %8 : vector<1x128xf32> to vector<8x128xf32>
    %53 = arith.mulf %51, %52 : vector<8x128xf32>
    %54 = arith.mulf %53, %53 : vector<8x128xf32>
    %cst_16 = arith.constant dense<0.000000e+00> : vector<8xf32>
    %55 = vector.multi_reduction <add>, %54, %cst_16 [1] : vector<8x128xf32> to vector<8xf32>
    %56 = vector.shape_cast %55 : vector<8xf32> to vector<8x1xf32>
    %cst_17 = arith.constant 3.125000e-02 : f32
    %57 = vector.broadcast %cst_17 : f32 to vector<8x1xf32>
    %58 = arith.mulf %56, %57 : vector<8x1xf32>
    %cst_18 = arith.constant 9.99999993E-9 : f32
    %59 = vector.broadcast %cst_18 : f32 to vector<8x1xf32>
    %60 = arith.addf %58, %59 : vector<8x1xf32>
    %61 = math.rsqrt %60 : vector<8x1xf32>
    %62 = vector.broadcast %61 : vector<8x1xf32> to vector<8x128xf32>
    %63 = arith.mulf %53, %62 : vector<8x128xf32>
    %64 = vector.shape_cast %43 : vector<128xf32> to vector<1x128xf32>
    %65 = vector.broadcast %64 : vector<1x128xf32> to vector<8x128xf32>
    %66 = arith.mulf %63, %65 : vector<8x128xf32>
    %67 = vector.shape_cast %45 : vector<128xf32> to vector<1x128xf32>
    %68 = vector.broadcast %67 : vector<1x128xf32> to vector<8x128xf32>
    %69 = arith.addf %66, %68 : vector<8x128xf32>
    %c0_19 = arith.constant 0 : index
    %c0_20 = arith.constant 0 : index
    %c0_21 = arith.constant 0 : index
    %70 = vector.load %arg6[%c0_19, %c0_20, %c0_21] : memref<2x128x128xf32, #tpu.memory_space<vmem>>, vector<1x128x128xf32>
    %71 = vector.shape_cast %70 : vector<1x128x128xf32> to vector<128x128xf32>
    %cst_22 = arith.constant dense<0.000000e+00> : vector<8x128xf32>
    %72 = tpu.matmul %69, %71, %cst_22 {dimension_numbers = #tpu.dot_dimension_numbers<[1], [0], [0], [1], [0, 0, 1, 1], [], []>} : vector<8x128xf32>, vector<128x128xf32>, vector<8x128xf32> -> vector<8x128xf32>
    %c0_23 = arith.constant 0 : index
    %c0_24 = arith.constant 0 : index
    %73 = vector.load %arg7[%c0_23, %c0_24] : memref<2x128xf32, #tpu.memory_space<vmem>>, vector<1x128xf32>
    %74 = vector.shape_cast %73 : vector<1x128xf32> to vector<128xf32>
    %75 = vector.shape_cast %74 : vector<128xf32> to vector<1x128xf32>
    %76 = vector.broadcast %75 : vector<1x128xf32> to vector<8x128xf32>
    %77 = arith.addf %72, %76 : vector<8x128xf32>
    %c0_25 = arith.constant 0 : index
    %c0_26 = arith.constant 0 : index
    %c0_27 = arith.constant 0 : index
    %78 = vector.load %arg8[%c0_25, %c0_26, %c0_27] : memref<2x128x256xf32, #tpu.memory_space<vmem>>, vector<1x128x256xf32>
    %79 = vector.shape_cast %78 : vector<1x128x256xf32> to vector<128x256xf32>
    %cst_28 = arith.constant dense<0.000000e+00> : vector<8x256xf32>
    %80 = tpu.matmul %1, %79, %cst_28 {dimension_numbers = #tpu.dot_dimension_numbers<[1], [0], [0], [1], [0, 0, 1, 1], [], []>} : vector<8x128xf32>, vector<128x256xf32>, vector<8x256xf32> -> vector<8x256xf32>
    %c0_29 = arith.constant 0 : index
    %c0_30 = arith.constant 0 : index
    %81 = vector.load %arg9[%c0_29, %c0_30] : memref<2x256xf32, #tpu.memory_space<vmem>>, vector<1x256xf32>
    %82 = vector.shape_cast %81 : vector<1x256xf32> to vector<256xf32>
    %83 = vector.shape_cast %82 : vector<256xf32> to vector<1x256xf32>
    %84 = vector.broadcast %83 : vector<1x256xf32> to vector<8x256xf32>
    %85 = arith.addf %80, %84 : vector<8x256xf32>
    %86 = vector.extract_strided_slice %85 {offsets = [0, 0], sizes = [8, 128], strides = [1, 1]} : vector<8x256xf32> to vector<8x128xf32>
    %87 = vector.extract_strided_slice %85 {offsets = [0, 128], sizes = [8, 128], strides = [1, 1]} : vector<8x256xf32> to vector<8x128xf32>
    %88 = vector.broadcast %15 : vector<1x128xf32> to vector<8x128xf32>
    %89 = arith.mulf %77, %88 : vector<8x128xf32>
    %90 = vector.broadcast %22 : vector<1x128xf32> to vector<8x128xf32>
    %91 = arith.mulf %77, %90 : vector<8x128xf32>
    %92 = tpu.concatenate %89, %91 in 0 : vector<8x128xf32>, vector<8x128xf32> -> vector<16x128xf32>
    %93 = vector.broadcast %15 : vector<1x128xf32> to vector<8x128xf32>
    %94 = arith.mulf %87, %93 : vector<8x128xf32>
    %95 = vector.broadcast %22 : vector<1x128xf32> to vector<8x128xf32>
    %96 = arith.mulf %87, %95 : vector<8x128xf32>
    %97 = tpu.concatenate %94, %96 in 0 : vector<8x128xf32>, vector<8x128xf32> -> vector<16x128xf32>
    "tpu.trace_start"() <{level = 10 : i32, message = "qc,kc->qk"}> : () -> ()
    %cst_31 = arith.constant dense<0.000000e+00> : vector<16x8xf32>
    %98 = tpu.matmul %92, %86, %cst_31 {dimension_numbers = #tpu.dot_dimension_numbers<[1], [1], [0], [0], [0, 0, 1, 0], [], []>} : vector<16x128xf32>, vector<8x128xf32>, vector<16x8xf32> -> vector<16x8xf32>
    "tpu.trace_stop"() : () -> ()
    %cst_32 = arith.constant 2.500000e-01 : f32
    %99 = vector.broadcast %cst_32 : f32 to vector<16x8xf32>
    %100 = arith.mulf %98, %99 : vector<16x8xf32>
    %cst_33 = arith.constant -1.000000e+30 : f32
    %101 = vector.broadcast %cst_33 : f32 to vector<16x8xf32>
    %102 = arith.select %41, %100, %101 : vector<16x8xi1>, vector<16x8xf32>
    %cst_34 = arith.constant dense<0xFF800000> : vector<16xf32>
    %103 = vector.multi_reduction <maximumf>, %102, %cst_34 [1] : vector<16x8xf32> to vector<16xf32>
    %104 = vector.shape_cast %103 : vector<16xf32> to vector<16x1xf32>
    %105 = vector.broadcast %104 : vector<16x1xf32> to vector<16x8xf32>
    %106 = arith.subf %102, %105 : vector<16x8xf32>
    %107 = math.exp %106 : vector<16x8xf32>
    %cst_35 = arith.constant dense<0.000000e+00> : vector<16xf32>
    %108 = vector.multi_reduction <add>, %107, %cst_35 [1] : vector<16x8xf32> to vector<16xf32>
    %109 = vector.shape_cast %108 : vector<16xf32> to vector<16x1xf32>
    %110 = tpu.reciprocal %109 {approx = true} : vector<16x1xf32> -> vector<16x1xf32>
    %111 = vector.broadcast %110 : vector<16x1xf32> to vector<16x8xf32>
    %112 = arith.mulf %107, %111 : vector<16x8xf32>
    %113 = vector.extract_strided_slice %112 {offsets = [0, 0], sizes = [8, 8], strides = [1, 1]} : vector<16x8xf32> to vector<8x8xf32>
    %114 = vector.extract_strided_slice %112 {offsets = [8, 0], sizes = [8, 8], strides = [1, 1]} : vector<16x8xf32> to vector<8x8xf32>
    %115 = tpu.concatenate %113, %114 in 1 : vector<8x8xf32>, vector<8x8xf32> -> vector<8x16xf32>
    %cst_36 = arith.constant dense<0.000000e+00> : vector<8x128xf32>
    %116 = tpu.matmul %115, %97, %cst_36 {dimension_numbers = #tpu.dot_dimension_numbers<[1], [0], [0], [1], [0, 0, 1, 1], [], []>} : vector<8x16xf32>, vector<16x128xf32>, vector<8x128xf32> -> vector<8x128xf32>
    %c0_37 = arith.constant 0 : index
    %c0_38 = arith.constant 0 : index
    %c0_39 = arith.constant 0 : index
    %117 = vector.load %arg10[%c0_37, %c0_38, %c0_39] : memref<2x128x128xf32, #tpu.memory_space<vmem>>, vector<1x128x128xf32>
    %118 = vector.shape_cast %117 : vector<1x128x128xf32> to vector<128x128xf32>
    %cst_40 = arith.constant dense<0.000000e+00> : vector<8x128xf32>
    %119 = tpu.matmul %116, %118, %cst_40 {dimension_numbers = #tpu.dot_dimension_numbers<[1], [0], [0], [1], [0, 0, 1, 1], [], []>} : vector<8x128xf32>, vector<128x128xf32>, vector<8x128xf32> -> vector<8x128xf32>
    %c0_41 = arith.constant 0 : index
    %c0_42 = arith.constant 0 : index
    %120 = vector.load %arg11[%c0_41, %c0_42] : memref<2x128xf32, #tpu.memory_space<vmem>>, vector<1x128xf32>
    %121 = vector.shape_cast %120 : vector<1x128xf32> to vector<128xf32>
    %122 = vector.shape_cast %121 : vector<128xf32> to vector<1x128xf32>
    %123 = vector.broadcast %122 : vector<1x128xf32> to vector<8x128xf32>
    %124 = arith.addf %119, %123 : vector<8x128xf32>
    %125 = arith.addf %69, %124 : vector<8x128xf32>
    %c0_43 = arith.constant 0 : index
    %c0_44 = arith.constant 0 : index
    %126 = vector.load %arg12[%c0_43, %c0_44] : memref<2x128xf32, #tpu.memory_space<vmem>>, vector<1x128xf32>
    %127 = vector.shape_cast %126 : vector<1x128xf32> to vector<128xf32>
    %c0_45 = arith.constant 0 : index
    %c0_46 = arith.constant 0 : index
    %128 = vector.load %arg13[%c0_45, %c0_46] : memref<2x128xf32, #tpu.memory_space<vmem>>, vector<1x128xf32>
    %129 = vector.shape_cast %128 : vector<1x128xf32> to vector<128xf32>
    %cst_47 = arith.constant dense<0.000000e+00> : vector<8xf32>
    %130 = vector.multi_reduction <add>, %125, %cst_47 [1] : vector<8x128xf32> to vector<8xf32>
    %131 = vector.shape_cast %130 : vector<8xf32> to vector<8x1xf32>
    %cst_48 = arith.constant 3.125000e-02 : f32
    %132 = vector.broadcast %cst_48 : f32 to vector<8x1xf32>
    %133 = arith.mulf %131, %132 : vector<8x1xf32>
    %134 = vector.broadcast %133 : vector<8x1xf32> to vector<8x128xf32>
    %135 = arith.subf %125, %134 : vector<8x128xf32>
    %136 = vector.broadcast %8 : vector<1x128xf32> to vector<8x128xf32>
    %137 = arith.mulf %135, %136 : vector<8x128xf32>
    %138 = arith.mulf %137, %137 : vector<8x128xf32>
    %cst_49 = arith.constant dense<0.000000e+00> : vector<8xf32>
    %139 = vector.multi_reduction <add>, %138, %cst_49 [1] : vector<8x128xf32> to vector<8xf32>
    %140 = vector.shape_cast %139 : vector<8xf32> to vector<8x1xf32>
    %cst_50 = arith.constant 3.125000e-02 : f32
    %141 = vector.broadcast %cst_50 : f32 to vector<8x1xf32>
    %142 = arith.mulf %140, %141 : vector<8x1xf32>
    %cst_51 = arith.constant 9.99999993E-9 : f32
    %143 = vector.broadcast %cst_51 : f32 to vector<8x1xf32>
    %144 = arith.addf %142, %143 : vector<8x1xf32>
    %145 = math.rsqrt %144 : vector<8x1xf32>
    %146 = vector.broadcast %145 : vector<8x1xf32> to vector<8x128xf32>
    %147 = arith.mulf %137, %146 : vector<8x128xf32>
    %148 = vector.shape_cast %127 : vector<128xf32> to vector<1x128xf32>
    %149 = vector.broadcast %148 : vector<1x128xf32> to vector<8x128xf32>
    %150 = arith.mulf %147, %149 : vector<8x128xf32>
    %151 = vector.shape_cast %129 : vector<128xf32> to vector<1x128xf32>
    %152 = vector.broadcast %151 : vector<1x128xf32> to vector<8x128xf32>
    %153 = arith.addf %150, %152 : vector<8x128xf32>
    %c0_52 = arith.constant 0 : index
    %c0_53 = arith.constant 0 : index
    %c0_54 = arith.constant 0 : index
    %154 = vector.load %arg14[%c0_52, %c0_53, %c0_54] : memref<2x128x128xf32, #tpu.memory_space<vmem>>, vector<1x128x128xf32>
    %155 = vector.shape_cast %154 : vector<1x128x128xf32> to vector<128x128xf32>
    %cst_55 = arith.constant dense<0.000000e+00> : vector<8x128xf32>
    %156 = tpu.matmul %153, %155, %cst_55 {dimension_numbers = #tpu.dot_dimension_numbers<[1], [0], [0], [1], [0, 0, 1, 1], [], []>} : vector<8x128xf32>, vector<128x128xf32>, vector<8x128xf32> -> vector<8x128xf32>
    %c0_56 = arith.constant 0 : index
    %c0_57 = arith.constant 0 : index
    %157 = vector.load %arg15[%c0_56, %c0_57] : memref<2x128xf32, #tpu.memory_space<vmem>>, vector<1x128xf32>
    %158 = vector.shape_cast %157 : vector<1x128xf32> to vector<128xf32>
    %159 = vector.shape_cast %158 : vector<128xf32> to vector<1x128xf32>
    %160 = vector.broadcast %159 : vector<1x128xf32> to vector<8x128xf32>
    %161 = arith.addf %156, %160 : vector<8x128xf32>
    %cst_58 = arith.constant 0.000000e+00 : f32
    %162 = vector.broadcast %cst_58 : f32 to vector<8x128xf32>
    %163 = arith.maximumf %161, %162 : vector<8x128xf32>
    %c0_59 = arith.constant 0 : index
    %c0_60 = arith.constant 0 : index
    %c0_61 = arith.constant 0 : index
    %164 = vector.load %arg16[%c0_59, %c0_60, %c0_61] : memref<2x128x128xf32, #tpu.memory_space<vmem>>, vector<1x128x128xf32>
    %165 = vector.shape_cast %164 : vector<1x128x128xf32> to vector<128x128xf32>
    %cst_62 = arith.constant dense<0.000000e+00> : vector<8x128xf32>
    %166 = tpu.matmul %163, %165, %cst_62 {dimension_numbers = #tpu.dot_dimension_numbers<[1], [0], [0], [1], [0, 0, 1, 1], [], []>} : vector<8x128xf32>, vector<128x128xf32>, vector<8x128xf32> -> vector<8x128xf32>
    %c0_63 = arith.constant 0 : index
    %c0_64 = arith.constant 0 : index
    %167 = vector.load %arg17[%c0_63, %c0_64] : memref<2x128xf32, #tpu.memory_space<vmem>>, vector<1x128xf32>
    %168 = vector.shape_cast %167 : vector<1x128xf32> to vector<128xf32>
    %169 = vector.shape_cast %168 : vector<128xf32> to vector<1x128xf32>
    %170 = vector.broadcast %169 : vector<1x128xf32> to vector<8x128xf32>
    %171 = arith.addf %166, %170 : vector<8x128xf32>
    %172 = arith.addf %153, %171 : vector<8x128xf32>
    %173 = arith.mulf %172, %3 : vector<8x128xf32>
    %c1 = arith.constant 1 : index
    %c0_65 = arith.constant 0 : index
    %174 = vector.load %arg4[%c1, %c0_65] : memref<2x128xf32, #tpu.memory_space<vmem>>, vector<1x128xf32>
    %175 = vector.shape_cast %174 : vector<1x128xf32> to vector<128xf32>
    %c1_66 = arith.constant 1 : index
    %c0_67 = arith.constant 0 : index
    %176 = vector.load %arg5[%c1_66, %c0_67] : memref<2x128xf32, #tpu.memory_space<vmem>>, vector<1x128xf32>
    %177 = vector.shape_cast %176 : vector<1x128xf32> to vector<128xf32>
    %cst_68 = arith.constant dense<0.000000e+00> : vector<8xf32>
    %178 = vector.multi_reduction <add>, %173, %cst_68 [1] : vector<8x128xf32> to vector<8xf32>
    %179 = vector.shape_cast %178 : vector<8xf32> to vector<8x1xf32>
    %cst_69 = arith.constant 3.125000e-02 : f32
    %180 = vector.broadcast %cst_69 : f32 to vector<8x1xf32>
    %181 = arith.mulf %179, %180 : vector<8x1xf32>
    %182 = vector.broadcast %181 : vector<8x1xf32> to vector<8x128xf32>
    %183 = arith.subf %173, %182 : vector<8x128xf32>
    %184 = vector.broadcast %8 : vector<1x128xf32> to vector<8x128xf32>
    %185 = arith.mulf %183, %184 : vector<8x128xf32>
    %186 = arith.mulf %185, %185 : vector<8x128xf32>
    %cst_70 = arith.constant dense<0.000000e+00> : vector<8xf32>
    %187 = vector.multi_reduction <add>, %186, %cst_70 [1] : vector<8x128xf32> to vector<8xf32>
    %188 = vector.shape_cast %187 : vector<8xf32> to vector<8x1xf32>
    %cst_71 = arith.constant 3.125000e-02 : f32
    %189 = vector.broadcast %cst_71 : f32 to vector<8x1xf32>
    %190 = arith.mulf %188, %189 : vector<8x1xf32>
    %cst_72 = arith.constant 9.99999993E-9 : f32
    %191 = vector.broadcast %cst_72 : f32 to vector<8x1xf32>
    %192 = arith.addf %190, %191 : vector<8x1xf32>
    %193 = math.rsqrt %192 : vector<8x1xf32>
    %194 = vector.broadcast %193 : vector<8x1xf32> to vector<8x128xf32>
    %195 = arith.mulf %185, %194 : vector<8x128xf32>
    %196 = vector.shape_cast %175 : vector<128xf32> to vector<1x128xf32>
    %197 = vector.broadcast %196 : vector<1x128xf32> to vector<8x128xf32>
    %198 = arith.mulf %195, %197 : vector<8x128xf32>
    %199 = vector.shape_cast %177 : vector<128xf32> to vector<1x128xf32>
    %200 = vector.broadcast %199 : vector<1x128xf32> to vector<8x128xf32>
    %201 = arith.addf %198, %200 : vector<8x128xf32>
    %c1_73 = arith.constant 1 : index
    %c0_74 = arith.constant 0 : index
    %c0_75 = arith.constant 0 : index
    %202 = vector.load %arg6[%c1_73, %c0_74, %c0_75] : memref<2x128x128xf32, #tpu.memory_space<vmem>>, vector<1x128x128xf32>
    %203 = vector.shape_cast %202 : vector<1x128x128xf32> to vector<128x128xf32>
    %cst_76 = arith.constant dense<0.000000e+00> : vector<8x128xf32>
    %204 = tpu.matmul %201, %203, %cst_76 {dimension_numbers = #tpu.dot_dimension_numbers<[1], [0], [0], [1], [0, 0, 1, 1], [], []>} : vector<8x128xf32>, vector<128x128xf32>, vector<8x128xf32> -> vector<8x128xf32>
    %c1_77 = arith.constant 1 : index
    %c0_78 = arith.constant 0 : index
    %205 = vector.load %arg7[%c1_77, %c0_78] : memref<2x128xf32, #tpu.memory_space<vmem>>, vector<1x128xf32>
    %206 = vector.shape_cast %205 : vector<1x128xf32> to vector<128xf32>
    %207 = vector.shape_cast %206 : vector<128xf32> to vector<1x128xf32>
    %208 = vector.broadcast %207 : vector<1x128xf32> to vector<8x128xf32>
    %209 = arith.addf %204, %208 : vector<8x128xf32>
    %c1_79 = arith.constant 1 : index
    %c0_80 = arith.constant 0 : index
    %c0_81 = arith.constant 0 : index
    %210 = vector.load %arg8[%c1_79, %c0_80, %c0_81] : memref<2x128x256xf32, #tpu.memory_space<vmem>>, vector<1x128x256xf32>
    %211 = vector.shape_cast %210 : vector<1x128x256xf32> to vector<128x256xf32>
    %cst_82 = arith.constant dense<0.000000e+00> : vector<8x256xf32>
    %212 = tpu.matmul %173, %211, %cst_82 {dimension_numbers = #tpu.dot_dimension_numbers<[1], [0], [0], [1], [0, 0, 1, 1], [], []>} : vector<8x128xf32>, vector<128x256xf32>, vector<8x256xf32> -> vector<8x256xf32>
    %c1_83 = arith.constant 1 : index
    %c0_84 = arith.constant 0 : index
    %213 = vector.load %arg9[%c1_83, %c0_84] : memref<2x256xf32, #tpu.memory_space<vmem>>, vector<1x256xf32>
    %214 = vector.shape_cast %213 : vector<1x256xf32> to vector<256xf32>
    %215 = vector.shape_cast %214 : vector<256xf32> to vector<1x256xf32>
    %216 = vector.broadcast %215 : vector<1x256xf32> to vector<8x256xf32>
    %217 = arith.addf %212, %216 : vector<8x256xf32>
    %218 = vector.extract_strided_slice %217 {offsets = [0, 0], sizes = [8, 128], strides = [1, 1]} : vector<8x256xf32> to vector<8x128xf32>
    %219 = vector.extract_strided_slice %217 {offsets = [0, 128], sizes = [8, 128], strides = [1, 1]} : vector<8x256xf32> to vector<8x128xf32>
    %220 = vector.broadcast %15 : vector<1x128xf32> to vector<8x128xf32>
    %221 = arith.mulf %209, %220 : vector<8x128xf32>
    %222 = vector.broadcast %22 : vector<1x128xf32> to vector<8x128xf32>
    %223 = arith.mulf %209, %222 : vector<8x128xf32>
    %224 = tpu.concatenate %221, %223 in 0 : vector<8x128xf32>, vector<8x128xf32> -> vector<16x128xf32>
    %225 = vector.broadcast %15 : vector<1x128xf32> to vector<8x128xf32>
    %226 = arith.mulf %219, %225 : vector<8x128xf32>
    %227 = vector.broadcast %22 : vector<1x128xf32> to vector<8x128xf32>
    %228 = arith.mulf %219, %227 : vector<8x128xf32>
    %229 = tpu.concatenate %226, %228 in 0 : vector<8x128xf32>, vector<8x128xf32> -> vector<16x128xf32>
    "tpu.trace_start"() <{level = 10 : i32, message = "qc,kc->qk"}> : () -> ()
    %cst_85 = arith.constant dense<0.000000e+00> : vector<16x8xf32>
    %230 = tpu.matmul %224, %218, %cst_85 {dimension_numbers = #tpu.dot_dimension_numbers<[1], [1], [0], [0], [0, 0, 1, 0], [], []>} : vector<16x128xf32>, vector<8x128xf32>, vector<16x8xf32> -> vector<16x8xf32>
    "tpu.trace_stop"() : () -> ()
    %cst_86 = arith.constant 2.500000e-01 : f32
    %231 = vector.broadcast %cst_86 : f32 to vector<16x8xf32>
    %232 = arith.mulf %230, %231 : vector<16x8xf32>
    %cst_87 = arith.constant -1.000000e+30 : f32
    %233 = vector.broadcast %cst_87 : f32 to vector<16x8xf32>
    %234 = arith.select %41, %232, %233 : vector<16x8xi1>, vector<16x8xf32>
    %cst_88 = arith.constant dense<0xFF800000> : vector<16xf32>
    %235 = vector.multi_reduction <maximumf>, %234, %cst_88 [1] : vector<16x8xf32> to vector<16xf32>
    %236 = vector.shape_cast %235 : vector<16xf32> to vector<16x1xf32>
    %237 = vector.broadcast %236 : vector<16x1xf32> to vector<16x8xf32>
    %238 = arith.subf %234, %237 : vector<16x8xf32>
    %239 = math.exp %238 : vector<16x8xf32>
    %cst_89 = arith.constant dense<0.000000e+00> : vector<16xf32>
    %240 = vector.multi_reduction <add>, %239, %cst_89 [1] : vector<16x8xf32> to vector<16xf32>
    %241 = vector.shape_cast %240 : vector<16xf32> to vector<16x1xf32>
    %242 = tpu.reciprocal %241 {approx = true} : vector<16x1xf32> -> vector<16x1xf32>
    %243 = vector.broadcast %242 : vector<16x1xf32> to vector<16x8xf32>
    %244 = arith.mulf %239, %243 : vector<16x8xf32>
    %245 = vector.extract_strided_slice %244 {offsets = [0, 0], sizes = [8, 8], strides = [1, 1]} : vector<16x8xf32> to vector<8x8xf32>
    %246 = vector.extract_strided_slice %244 {offsets = [8, 0], sizes = [8, 8], strides = [1, 1]} : vector<16x8xf32> to vector<8x8xf32>
    %247 = tpu.concatenate %245, %246 in 1 : vector<8x8xf32>, vector<8x8xf32> -> vector<8x16xf32>
    %cst_90 = arith.constant dense<0.000000e+00> : vector<8x128xf32>
    %248 = tpu.matmul %247, %229, %cst_90 {dimension_numbers = #tpu.dot_dimension_numbers<[1], [0], [0], [1], [0, 0, 1, 1], [], []>} : vector<8x16xf32>, vector<16x128xf32>, vector<8x128xf32> -> vector<8x128xf32>
    %c1_91 = arith.constant 1 : index
    %c0_92 = arith.constant 0 : index
    %c0_93 = arith.constant 0 : index
    %249 = vector.load %arg10[%c1_91, %c0_92, %c0_93] : memref<2x128x128xf32, #tpu.memory_space<vmem>>, vector<1x128x128xf32>
    %250 = vector.shape_cast %249 : vector<1x128x128xf32> to vector<128x128xf32>
    %cst_94 = arith.constant dense<0.000000e+00> : vector<8x128xf32>
    %251 = tpu.matmul %248, %250, %cst_94 {dimension_numbers = #tpu.dot_dimension_numbers<[1], [0], [0], [1], [0, 0, 1, 1], [], []>} : vector<8x128xf32>, vector<128x128xf32>, vector<8x128xf32> -> vector<8x128xf32>
    %c1_95 = arith.constant 1 : index
    %c0_96 = arith.constant 0 : index
    %252 = vector.load %arg11[%c1_95, %c0_96] : memref<2x128xf32, #tpu.memory_space<vmem>>, vector<1x128xf32>
    %253 = vector.shape_cast %252 : vector<1x128xf32> to vector<128xf32>
    %254 = vector.shape_cast %253 : vector<128xf32> to vector<1x128xf32>
    %255 = vector.broadcast %254 : vector<1x128xf32> to vector<8x128xf32>
    %256 = arith.addf %251, %255 : vector<8x128xf32>
    %257 = arith.addf %201, %256 : vector<8x128xf32>
    %c1_97 = arith.constant 1 : index
    %c0_98 = arith.constant 0 : index
    %258 = vector.load %arg12[%c1_97, %c0_98] : memref<2x128xf32, #tpu.memory_space<vmem>>, vector<1x128xf32>
    %259 = vector.shape_cast %258 : vector<1x128xf32> to vector<128xf32>
    %c1_99 = arith.constant 1 : index
    %c0_100 = arith.constant 0 : index
    %260 = vector.load %arg13[%c1_99, %c0_100] : memref<2x128xf32, #tpu.memory_space<vmem>>, vector<1x128xf32>
    %261 = vector.shape_cast %260 : vector<1x128xf32> to vector<128xf32>
    %cst_101 = arith.constant dense<0.000000e+00> : vector<8xf32>
    %262 = vector.multi_reduction <add>, %257, %cst_101 [1] : vector<8x128xf32> to vector<8xf32>
    %263 = vector.shape_cast %262 : vector<8xf32> to vector<8x1xf32>
    %cst_102 = arith.constant 3.125000e-02 : f32
    %264 = vector.broadcast %cst_102 : f32 to vector<8x1xf32>
    %265 = arith.mulf %263, %264 : vector<8x1xf32>
    %266 = vector.broadcast %265 : vector<8x1xf32> to vector<8x128xf32>
    %267 = arith.subf %257, %266 : vector<8x128xf32>
    %268 = vector.broadcast %8 : vector<1x128xf32> to vector<8x128xf32>
    %269 = arith.mulf %267, %268 : vector<8x128xf32>
    %270 = arith.mulf %269, %269 : vector<8x128xf32>
    %cst_103 = arith.constant dense<0.000000e+00> : vector<8xf32>
    %271 = vector.multi_reduction <add>, %270, %cst_103 [1] : vector<8x128xf32> to vector<8xf32>
    %272 = vector.shape_cast %271 : vector<8xf32> to vector<8x1xf32>
    %cst_104 = arith.constant 3.125000e-02 : f32
    %273 = vector.broadcast %cst_104 : f32 to vector<8x1xf32>
    %274 = arith.mulf %272, %273 : vector<8x1xf32>
    %cst_105 = arith.constant 9.99999993E-9 : f32
    %275 = vector.broadcast %cst_105 : f32 to vector<8x1xf32>
    %276 = arith.addf %274, %275 : vector<8x1xf32>
    %277 = math.rsqrt %276 : vector<8x1xf32>
    %278 = vector.broadcast %277 : vector<8x1xf32> to vector<8x128xf32>
    %279 = arith.mulf %269, %278 : vector<8x128xf32>
    %280 = vector.shape_cast %259 : vector<128xf32> to vector<1x128xf32>
    %281 = vector.broadcast %280 : vector<1x128xf32> to vector<8x128xf32>
    %282 = arith.mulf %279, %281 : vector<8x128xf32>
    %283 = vector.shape_cast %261 : vector<128xf32> to vector<1x128xf32>
    %284 = vector.broadcast %283 : vector<1x128xf32> to vector<8x128xf32>
    %285 = arith.addf %282, %284 : vector<8x128xf32>
    %c1_106 = arith.constant 1 : index
    %c0_107 = arith.constant 0 : index
    %c0_108 = arith.constant 0 : index
    %286 = vector.load %arg14[%c1_106, %c0_107, %c0_108] : memref<2x128x128xf32, #tpu.memory_space<vmem>>, vector<1x128x128xf32>
    %287 = vector.shape_cast %286 : vector<1x128x128xf32> to vector<128x128xf32>
    %cst_109 = arith.constant dense<0.000000e+00> : vector<8x128xf32>
    %288 = tpu.matmul %285, %287, %cst_109 {dimension_numbers = #tpu.dot_dimension_numbers<[1], [0], [0], [1], [0, 0, 1, 1], [], []>} : vector<8x128xf32>, vector<128x128xf32>, vector<8x128xf32> -> vector<8x128xf32>
    %c1_110 = arith.constant 1 : index
    %c0_111 = arith.constant 0 : index
    %289 = vector.load %arg15[%c1_110, %c0_111] : memref<2x128xf32, #tpu.memory_space<vmem>>, vector<1x128xf32>
    %290 = vector.shape_cast %289 : vector<1x128xf32> to vector<128xf32>
    %291 = vector.shape_cast %290 : vector<128xf32> to vector<1x128xf32>
    %292 = vector.broadcast %291 : vector<1x128xf32> to vector<8x128xf32>
    %293 = arith.addf %288, %292 : vector<8x128xf32>
    %cst_112 = arith.constant 0.000000e+00 : f32
    %294 = vector.broadcast %cst_112 : f32 to vector<8x128xf32>
    %295 = arith.maximumf %293, %294 : vector<8x128xf32>
    %c1_113 = arith.constant 1 : index
    %c0_114 = arith.constant 0 : index
    %c0_115 = arith.constant 0 : index
    %296 = vector.load %arg16[%c1_113, %c0_114, %c0_115] : memref<2x128x128xf32, #tpu.memory_space<vmem>>, vector<1x128x128xf32>
    %297 = vector.shape_cast %296 : vector<1x128x128xf32> to vector<128x128xf32>
    %cst_116 = arith.constant dense<0.000000e+00> : vector<8x128xf32>
    %298 = tpu.matmul %295, %297, %cst_116 {dimension_numbers = #tpu.dot_dimension_numbers<[1], [0], [0], [1], [0, 0, 1, 1], [], []>} : vector<8x128xf32>, vector<128x128xf32>, vector<8x128xf32> -> vector<8x128xf32>
    %c1_117 = arith.constant 1 : index
    %c0_118 = arith.constant 0 : index
    %299 = vector.load %arg17[%c1_117, %c0_118] : memref<2x128xf32, #tpu.memory_space<vmem>>, vector<1x128xf32>
    %300 = vector.shape_cast %299 : vector<1x128xf32> to vector<128xf32>
    %301 = vector.shape_cast %300 : vector<128xf32> to vector<1x128xf32>
    %302 = vector.broadcast %301 : vector<1x128xf32> to vector<8x128xf32>
    %303 = arith.addf %298, %302 : vector<8x128xf32>
    %304 = arith.addf %285, %303 : vector<8x128xf32>
    %305 = arith.mulf %304, %3 : vector<8x128xf32>
    %c0_119 = arith.constant 0 : index
    %c0_120 = arith.constant 0 : index
    %306 = vector.load %arg18[%c0_119, %c0_120] : memref<1x128xf32, #tpu.memory_space<vmem>>, vector<1x128xf32>
    %307 = vector.shape_cast %306 : vector<1x128xf32> to vector<128xf32>
    %c0_121 = arith.constant 0 : index
    %c0_122 = arith.constant 0 : index
    %308 = vector.load %arg19[%c0_121, %c0_122] : memref<1x128xf32, #tpu.memory_space<vmem>>, vector<1x128xf32>
    %309 = vector.shape_cast %308 : vector<1x128xf32> to vector<128xf32>
    %cst_123 = arith.constant dense<0.000000e+00> : vector<8xf32>
    %310 = vector.multi_reduction <add>, %305, %cst_123 [1] : vector<8x128xf32> to vector<8xf32>
    %311 = vector.shape_cast %310 : vector<8xf32> to vector<8x1xf32>
    %cst_124 = arith.constant 3.125000e-02 : f32
    %312 = vector.broadcast %cst_124 : f32 to vector<8x1xf32>
    %313 = arith.mulf %311, %312 : vector<8x1xf32>
    %314 = vector.broadcast %313 : vector<8x1xf32> to vector<8x128xf32>
    %315 = arith.subf %305, %314 : vector<8x128xf32>
    %316 = vector.broadcast %8 : vector<1x128xf32> to vector<8x128xf32>
    %317 = arith.mulf %315, %316 : vector<8x128xf32>
    %318 = arith.mulf %317, %317 : vector<8x128xf32>
    %cst_125 = arith.constant dense<0.000000e+00> : vector<8xf32>
    %319 = vector.multi_reduction <add>, %318, %cst_125 [1] : vector<8x128xf32> to vector<8xf32>
    %320 = vector.shape_cast %319 : vector<8xf32> to vector<8x1xf32>
    %cst_126 = arith.constant 3.125000e-02 : f32
    %321 = vector.broadcast %cst_126 : f32 to vector<8x1xf32>
    %322 = arith.mulf %320, %321 : vector<8x1xf32>
    %cst_127 = arith.constant 9.99999993E-9 : f32
    %323 = vector.broadcast %cst_127 : f32 to vector<8x1xf32>
    %324 = arith.addf %322, %323 : vector<8x1xf32>
    %325 = math.rsqrt %324 : vector<8x1xf32>
    %326 = vector.broadcast %325 : vector<8x1xf32> to vector<8x128xf32>
    %327 = arith.mulf %317, %326 : vector<8x128xf32>
    %328 = vector.shape_cast %307 : vector<128xf32> to vector<1x128xf32>
    %329 = vector.broadcast %328 : vector<1x128xf32> to vector<8x128xf32>
    %330 = arith.mulf %327, %329 : vector<8x128xf32>
    %331 = vector.shape_cast %309 : vector<128xf32> to vector<1x128xf32>
    %332 = vector.broadcast %331 : vector<1x128xf32> to vector<8x128xf32>
    %333 = arith.addf %330, %332 : vector<8x128xf32>
    %c0_128 = arith.constant 0 : index
    %c0_129 = arith.constant 0 : index
    %c0_130 = arith.constant 0 : index
    %c0_131 = arith.constant 0 : index
    %334 = vector.load %arg3[%c0_128, %c0_129, %c0_130, %c0_131] : memref<1x2x8x128xf32, #tpu.memory_space<vmem>>, vector<1x2x8x128xf32>
    %335 = vector.shape_cast %334 : vector<1x2x8x128xf32> to vector<2x8x128xf32>
    %336 = vector.shape_cast %333 : vector<8x128xf32> to vector<1x8x128xf32>
    %337 = vector.broadcast %336 : vector<1x8x128xf32> to vector<2x8x128xf32>
    %338 = arith.mulf %337, %335 : vector<2x8x128xf32>
    %cst_132 = arith.constant dense<0.000000e+00> : vector<2x8xf32>
    %339 = vector.multi_reduction <add>, %338, %cst_132 [2] : vector<2x8x128xf32> to vector<2x8xf32>
    %c0_133 = arith.constant 0 : index
    %c0_134 = arith.constant 0 : index
    %c0_135 = arith.constant 0 : index
    %340 = vector.load %arg20[%c0_133, %c0_134, %c0_135] : memref<1x2x8xf32, #tpu.memory_space<vmem>>, vector<1x2x8xf32>
    %341 = vector.shape_cast %340 : vector<1x2x8xf32> to vector<2x8xf32>
    %342 = vector.shape_cast %339 : vector<2x8xf32> to vector<1x2x8xf32>
    tpu.vector_store %arg20[%c0_133, %c0_134, %c0_135], %342 {strides = array<i32>} : memref<1x2x8xf32, #tpu.memory_space<vmem>>, vector<1x2x8xf32>,
    return
  }
  func.func @transform_0(%arg0: i32) -> (i32, i32, i32) {
    %c0_i32 = arith.constant 0 : i32
    %c0_i32_0 = arith.constant 0 : i32
    %c0_i32_1 = arith.constant 0 : i32
    return %arg0, %c0_i32, %c0_i32_0 : i32, i32, i32
  }
  func.func @transform_1(%arg0: i32) -> (i32, i32, i32) {
    %c0_i32 = arith.constant 0 : i32
    %c0_i32_0 = arith.constant 0 : i32
    %c0_i32_1 = arith.constant 0 : i32
    return %arg0, %c0_i32, %c0_i32_0 : i32, i32, i32
  }
  func.func @transform_2(%arg0: i32) -> (i32, i32, i32, i32) {
    %c0_i32 = arith.constant 0 : i32
    %c0_i32_0 = arith.constant 0 : i32
    %c0_i32_1 = arith.constant 0 : i32
    %c0_i32_2 = arith.constant 0 : i32
    return %arg0, %c0_i32, %c0_i32_0, %c0_i32_1 : i32, i32, i32, i32
  }
  func.func @transform_3(%arg0: i32) -> (i32, i32) {
    %c0_i32 = arith.constant 0 : i32
    %c0_i32_0 = arith.constant 0 : i32
    %c0_i32_1 = arith.constant 0 : i32
    return %c0_i32, %c0_i32_0 : i32, i32
  }
  func.func @transform_4(%arg0: i32) -> (i32, i32) {
    %c0_i32 = arith.constant 0 : i32
    %c0_i32_0 = arith.constant 0 : i32
    %c0_i32_1 = arith.constant 0 : i32
    return %c0_i32, %c0_i32_0 : i32, i32
  }
  func.func @transform_5(%arg0: i32) -> (i32, i32, i32) {
    %c0_i32 = arith.constant 0 : i32
    %c0_i32_0 = arith.constant 0 : i32
    %c0_i32_1 = arith.constant 0 : i32
    %c0_i32_2 = arith.constant 0 : i32
    return %c0_i32, %c0_i32_0, %c0_i32_1 : i32, i32, i32
  }
  func.func @transform_6(%arg0: i32) -> (i32, i32) {
    %c0_i32 = arith.constant 0 : i32
    %c0_i32_0 = arith.constant 0 : i32
    %c0_i32_1 = arith.constant 0 : i32
    return %c0_i32, %c0_i32_0 : i32, i32
  }
  func.func @transform_7(%arg0: i32) -> (i32, i32, i32) {
    %c0_i32 = arith.constant 0 : i32
    %c0_i32_0 = arith.constant 0 : i32
    %c0_i32_1 = arith.constant 0 : i32
    %c0_i32_2 = arith.constant 0 : i32
    return %c0_i32, %c0_i32_0, %c0_i32_1 : i32, i32, i32
  }
  func.func @transform_8(%arg0: i32) -> (i32, i32) {
    %c0_i32 = arith.constant 0 : i32
    %c0_i32_0 = arith.constant 0 : i32
    %c0_i32_1 = arith.constant 0 : i32
    return %c0_i32, %c0_i32_0 : i32, i32
  }
  func.func @transform_9(%arg0: i32) -> (i32, i32, i32) {
    %c0_i32 = arith.constant 0 : i32
    %c0_i32_0 = arith.constant 0 : i32
    %c0_i32_1 = arith.constant 0 : i32
    %c0_i32_2 = arith.constant 0 : i32
    return %c0_i32, %c0_i32_0, %c0_i32_1 : i32, i32, i32
  }
  func.func @transform_10(%arg0: i32) -> (i32, i32) {
    %c0_i32 = arith.constant 0 : i32
    %c0_i32_0 = arith.constant 0 : i32
    %c0_i32_1 = arith.constant 0 : i32
    return %c0_i32, %c0_i32_0 : i32, i32
  }
  func.func @transform_11(%arg0: i32) -> (i32, i32) {
    %c0_i32 = arith.constant 0 : i32
    %c0_i32_0 = arith.constant 0 : i32
    %c0_i32_1 = arith.constant 0 : i32
    return %c0_i32, %c0_i32_0 : i32, i32
  }
  func.func @transform_12(%arg0: i32) -> (i32, i32) {
    %c0_i32 = arith.constant 0 : i32
    %c0_i32_0 = arith.constant 0 : i32
    %c0_i32_1 = arith.constant 0 : i32
    return %c0_i32, %c0_i32_0 : i32, i32
  }
  func.func @transform_13(%arg0: i32) -> (i32, i32, i32) {
    %c0_i32 = arith.constant 0 : i32
    %c0_i32_0 = arith.constant 0 : i32
    %c0_i32_1 = arith.constant 0 : i32
    %c0_i32_2 = arith.constant 0 : i32
    return %c0_i32, %c0_i32_0, %c0_i32_1 : i32, i32, i32
  }
  func.func @transform_14(%arg0: i32) -> (i32, i32) {
    %c0_i32 = arith.constant 0 : i32
    %c0_i32_0 = arith.constant 0 : i32
    %c0_i32_1 = arith.constant 0 : i32
    return %c0_i32, %c0_i32_0 : i32, i32
  }
  func.func @transform_15(%arg0: i32) -> (i32, i32, i32) {
    %c0_i32 = arith.constant 0 : i32
    %c0_i32_0 = arith.constant 0 : i32
    %c0_i32_1 = arith.constant 0 : i32
    %c0_i32_2 = arith.constant 0 : i32
    return %c0_i32, %c0_i32_0, %c0_i32_1 : i32, i32, i32
  }
  func.func @transform_16(%arg0: i32) -> (i32, i32) {
    %c0_i32 = arith.constant 0 : i32
    %c0_i32_0 = arith.constant 0 : i32
    %c0_i32_1 = arith.constant 0 : i32
    return %c0_i32, %c0_i32_0 : i32, i32
  }
  func.func @transform_17(%arg0: i32) -> (i32, i32) {
    %c0_i32 = arith.constant 0 : i32
    %c0_i32_0 = arith.constant 0 : i32
    %c0_i32_1 = arith.constant 0 : i32
    return %c0_i32, %c0_i32_0 : i32, i32
  }
  func.func @transform_18(%arg0: i32) -> (i32, i32) {
    %c0_i32 = arith.constant 0 : i32
    %c0_i32_0 = arith.constant 0 : i32
    %c0_i32_1 = arith.constant 0 : i32
    return %c0_i32, %c0_i32_0 : i32, i32
  }
  func.func @transform_19(%arg0: i32) -> (i32, i32, i32) {
    %c0_i32 = arith.constant 0 : i32
    %c0_i32_0 = arith.constant 0 : i32
    %c0_i32_1 = arith.constant 0 : i32
    return %arg0, %c0_i32, %c0_i32_0 : i32, i32, i32
  }
}

</mosaic_0001>

<bundles_post_ra>
// kernel: sasrec_forward.1
= control target key start
LH: loop header
LB: loop body
LE: loop exit
PB: predicated region body
PF: predicated region fallthrough
CT: control target
= control target key end

     0   :  { %s2606_s0 = inlined_call_operand.vmem [shape: f32[2,8,128], index: 0, kind: input, shape index: {}]   ;;  %s2607_s1 = inlined_call_operand.vmem [shape: f32[2,8,128], index: 1, kind: input, shape index: {}]   ;;  %s2608_s2 = inlined_call_operand.vmem [shape: f32[2,2,8,128], index: 2, kind: input, shape index: {}]   ;;  %s2609_s3 = inlined_call_operand.vmem [shape: f32[2,128], index: 3, kind: input, shape index: {}]   ;;  %s2610_s4 = inlined_call_operand.vmem [shape: f32[2,128], index: 4, kind: input, shape index: {}]   ;;  %s2611_s5 = inlined_call_operand.vmem [shape: f32[2,128,128], index: 5, kind: input, shape index: {}]   ;;  %s2612_s6 = inlined_call_operand.vmem [shape: f32[2,128], index: 6, kind: input, shape index: {}]   ;;  %s2613_s7 = inlined_call_operand.vmem [shape: f32[2,128,256], index: 7, kind: input, shape index: {}]   ;;  %s2614_s8 = inlined_call_operand.vmem [shape: f32[2,256], index: 8, kind: input, shape index: {}]   ;;  %s2615_s9 = inlined_call_operand.vmem [shape: f32[2,128,128], index: 9, kind: input, shape index: {}]   ;;  %s2616_s10 = inlined_call_operand.vmem [shape: f32[2,128], index: 10, kind: input, shape index: {}]   ;;  %s2617_s11 = inlined_call_operand.vmem [shape: f32[2,128], index: 11, kind: input, shape index: {}]   ;;  %s2618_s12 = inlined_call_operand.vmem [shape: f32[2,128], index: 12, kind: input, shape index: {}]   ;;  %s2619_s13 = inlined_call_operand.vmem [shape: f32[2,128,128], index: 13, kind: input, shape index: {}]   ;;  %s2620_s14 = inlined_call_operand.vmem [shape: f32[2,128], index: 14, kind: input, shape index: {}]   ;;  %s2621_s15 = inlined_call_operand.vmem [shape: f32[2,128,128], index: 15, kind: input, shape index: {}]   ;;  %s2622_s16 = inlined_call_operand.vmem [shape: f32[2,128], index: 16, kind: input, shape index: {}]   ;;  %s2623_s17 = inlined_call_operand.vmem [shape: f32[1,128], index: 17, kind: input, shape index: {}]   ;;  %s2624_s18 = inlined_call_operand.vmem [shape: f32[1,128], index: 18, kind: input, shape index: {}]   ;;  %s2625_s19 = inlined_call_operand.vmem [shape: f32[2,2,8], index: 19, kind: output, shape index: {}]  }
   0x1   :  { %2627 = sst [smem:[#allocation2_spill]] %s2606_s0  ;;  %s1830_s0 = smov 0  }
   0x2   :  { %2628 = sst [smem:[#allocation3_spill]] %s2607_s1 }
   0x3   :  { %2629 = sst [smem:[#allocation4_spill]] %s2608_s2 }
   0x4   :  { %2630 = sst [smem:[#allocation5_spill]] %s2609_s3 }
   0x5 LB: > { %s1551_s30 = sadd.s32 4294967295, %s1726_s0   ;;  %p1555_p0 = scmp.ge.s32.totalorder %s1726_s0, 1  ;;  %s1726_s0 = sphi %s1830_s0, %s29_s0  }
   0x6   : > { %p555_p1 = scmp.lt.s32.totalorder %s1726_s0, 3 }
   0x8   : > { %p556_p2 = pnand %p1555_p0, %p555_p1 }
   0x9   : > { %p618_p3 = scmp.lt.s32.totalorder (!%p556_p2), %s1551_s30, 1  ;;  %s2631_s22 = sld [smem:[#allocation2_spill]] (!%p556_p2) }
   0xa   : > { %559 = sbr.rel (%p556_p2) target bundleno = 3803 (0xedb), region = 96  ;;  %s2632_s28 = sld [smem:[#allocation5_spill]] (!%p556_p2) }
   0xb   : > { %s1729_s23 = smov (!%p556_p2), 8   ;;  %s2637_s24 = sld [smem:[#allocation3_spill]] (!%p556_p2) }
   0xc   : > { %s2638_s29 = sld [smem:[#allocation4_spill]] (!%p556_p2) }
   0xf   : > { %s2640_s30 = smov (!%p618_p3, %s1551_s30), 1  ;;  %v775_v1 = vld [vmem:[%s2613_s7 + $0xf0] sm:$0xff]  ;;  %v773_v2 = vld [vmem:[%s2613_s7 + $0xe0] sm:$0xff]  ;;  %v722_v3 = vld [vmem:[%s2611_s5 + $0x78] sm:$0xff]  ;;  %v637_v8 = vlaneseq  ;;  %v1728_v12 = vmov 0.0   ;;  %vm854_vm8 = vcmask 64512  }
  0x10   : > { %s1556_s20 = sshll.u32 %s2640_s30, 3  ;;  %783 = vmatpush.msra.mxu1 %v775_v1  ;;  %v721_v4 = vld [vmem:[%s2611_s5 + $0x70] sm:$0xff]  ;;  %725 = vmatpush.msra.mxu0 %v722_v3  ;;  %v769_v6 = vld [vmem:[%s2613_s7 + $0xc0] sm:$0xff]  ;;  %v720_v17 = vld [vmem:[%s2611_s5 + $0x68] sm:$0xff]  ;;  %vm882_vm10 = vcmask 130048  }
  0x11   : > { %s621_s2 = scalar_lea.vmem %s2631_s22, %s1556_s20  ;;  %v771_v5 = vld [vmem:[%s2613_s7 + $0xd0] sm:$0xff]  ;;  %v1871_v9 = vand.u32 127, %v637_v8  ;;  %v719_v18 = vld [vmem:[%s2611_s5 + $0x60] sm:$0xff]  ;;  %v718_v19 = vld [vmem:[%s2611_s5 + $0x58] sm:$0xff]  ;;  %s625_s25 = scalar_lea.vmem %s2637_s24, %s1556_s20 }
  0x12   : > { %v1846_v0 = vld [vmem:[%s621_s2] sm:$0xff]  ;;  %784 = vmatpush.msra.mxu1 %v773_v2  ;;  %726 = vmatpush.msra.mxu0 %v721_v4  ;;  %v767_v7 = vld [vmem:[%s2613_s7 + $0xb0] sm:$0xff]  ;;  %v716_v23 = vld [vmem:[%s2611_s5 + $0x48] sm:$0xff]  ;;  %s1665_s24 = sshll.u32 %s2640_s30, 4  ;;  %s1560_s22 = sshll.u32 %s2640_s30, 1 }
  0x13   : > { %682 = vadd.xlane.f32.xlu0 %v1846_v0  ;;  %vm639_vm0 = vcmp.lt.s32.totalorder %v1871_v9, 32  ;;  %v765_v20 = vld [vmem:[%s2613_s7 + $0xa0] sm:$0xff]  ;;  %v717_v21 = vld [vmem:[%s2611_s5 + $0x50] sm:$0xff]  ;;  %v714_v27 = vld [vmem:[%s2611_s5 + $0x38] sm:$0xff]  ;;  %vm643_vm4 = vcmp.lt.s32.totalorder %v1871_v9, 16  ;;  %vm647_vm5 = vcmp.ge.s32.totalorder %v1871_v9, 16  ;;  %s630_s20 = scalar_lea.vmem %s2638_s29, %s1665_s24  ;;  %s634_s24 = scalar_lea.vmem %s2625_s19, %s1560_s22 }
  0x14   : > { %785 = vmatpush.msra.mxu1 %v771_v5  ;;  %v1877_v13 = vsel %vm639_vm0, 1.0, %v1728_v12  ;;  %727 = vmatpush.msra.mxu0 %v720_v17  ;;  %v763_v22 = vld [vmem:[%s2613_s7 + $0x90] sm:$0xff]  ;;  %v761_v24 = vld [vmem:[%s2613_s7 + $0x80] sm:$0xff]  ;;  %v712_v31 = vld [vmem:[%s2611_s5 + $0x28] sm:$0xff]  ;;  %v1982_v62 = vsel %vm643_vm4, 1.0, %v1728_v12  ;;  %v652_v5 = vshrl.u32 %v637_v8, 7 }
  0x15   : > { %v715_v25 = vld [vmem:[%s2611_s5 + $0x40] sm:$0xff]  ;;  %v759_v26 = vld [vmem:[%s2613_s7 + $0x70] sm:$0xff]  ;;  %v710_v36 = vld [vmem:[%s2611_s5 + $0x18] sm:$0xff] }
  0x16   : > { %786 = vmatpush.msra.mxu1 %v769_v6  ;;  %728 = vmatpush.msra.mxu0 %v719_v18  ;;  %v757_v28 = vld [vmem:[%s2613_s7 + $0x60] sm:$0xff]  ;;  %v713_v29 = vld [vmem:[%s2611_s5 + $0x30] sm:$0xff]  ;;  %v708_v39 = vld [vmem:[%s2611_s5 + $0x8] sm:$0xff] }
  0x17   : > { %v755_v30 = vld [vmem:[%s2613_s7 + $0x50] sm:$0xff]  ;;  %v753_v32 = vld [vmem:[%s2613_s7 + $0x40] sm:$0xff]  ;;  %vm648_vm6 = vmand %vm647_vm5, %vm639_vm0 }
  0x18   : > { %787 = vmatpush.msra.mxu1 %v767_v7  ;;  %729 = vmatpush.msra.mxu0 %v718_v19  ;;  %v711_v33 = vld [vmem:[%s2611_s5 + $0x20] sm:$0xff]  ;;  %v751_v34 = vld [vmem:[%s2613_s7 + $0x30] sm:$0xff]  ;;  %v1989_v3 = vsel %vm648_vm6, 1.0, %v1728_v12  ;;  %v653_v7 = vadd.s32 8, %v652_v5 }
  0x19   : > { %v749_v35 = vld [vmem:[%s2613_s7 + $0x20] sm:$0xff]  ;;  %v709_v37 = vld [vmem:[%s2611_s5 + $0x10] sm:$0xff] }
  0x1a   : > { %788 = vmatpush.msra.mxu1 %v765_v20  ;;  %730 = vmatpush.msra.mxu0 %v717_v21  ;;  %v747_v38 = vld [vmem:[%s2613_s7 + $0x10] sm:$0xff]  ;;  %v745_v40 = vld [vmem:[%s2613_s7] sm:$0xff]  ;;  %v776_v21 = vld [vmem:[%s2613_s7 + $0xf8] sm:$0xff] }
  0x1b   : > { %v707_v41 = vld [vmem:[%s2611_s5] sm:$0xff]  ;;  %803 = vmatpush.msra.mxu2 %v776_v21 }
  0x1c   : > { %789 = vmatpush.msra.mxu1 %v763_v22  ;;  %731 = vmatpush.msra.mxu0 %v716_v23  ;;  %v1676_v51 = vld [vmem:[%s2632_s28] ss:$0 sm:$0xff]  ;;  %v774_v22 = vld [vmem:[%s2613_s7 + $0xe8] sm:$0xff]  ;;  %v772_v23 = vld [vmem:[%s2613_s7 + $0xd8] sm:$0xff] }
  0x1d   : > { %v1677_v54 = vld [vmem:[%s2610_s4] ss:$0 sm:$0xff]  ;;  %804 = vmatpush.msra.mxu2 %v774_v22 }
  0x1e   : > { %790 = vmatpush.msra.mxu1 %v761_v24  ;;  %732 = vmatpush.msra.mxu0 %v715_v25  ;;  %v1974_v57 = vld [vmem:[%s2614_s8] ss:$2 sm:$0x3]  ;;  %v770_v24 = vld [vmem:[%s2613_s7 + $0xc8] sm:$0xff]  ;;  %v768_v25 = vld [vmem:[%s2613_s7 + $0xb8] sm:$0xff] }
  0x1f   : > { %v779_v58 = vperm.slane %v1974_v57, 0  ;;  %v1678_v61 = vld [vmem:[%s2612_s6] ss:$0 sm:$0xff]  ;;  %805 = vmatpush.msra.mxu2 %v772_v23 }
  0x20   : > { %791 = vmatpush.msra.mxu1 %v759_v26  ;;  %733 = vmatpush.msra.mxu0 %v714_v27  ;;  %v766_v26 = vld [vmem:[%s2613_s7 + $0xa8] sm:$0xff]  ;;  %v764_v27 = vld [vmem:[%s2613_s7 + $0x98] sm:$0xff] }
  0x21   : > { %806 = vmatpush.msra.mxu2 %v770_v24  ;;  %v987_v24 = vld [vmem:[%s2619_s13 + $0x78] sm:$0xff] }
  0x22   : > { %792 = vmatpush.msra.mxu1 %v757_v28  ;;  %734 = vmatpush.msra.mxu0 %v713_v29 }
  0x23   : > { %807 = vmatpush.msra.mxu2 %v768_v25  ;;  %v986_v25 = vld [vmem:[%s2619_s13 + $0x70] sm:$0xff] }
  0x24   : > { %793 = vmatpush.msra.mxu1 %v755_v30  ;;  %735 = vmatpush.msra.mxu0 %v712_v31  ;;  %v762_v30 = vld [vmem:[%s2613_s7 + $0x88] sm:$0xff] }
  0x25   : > { %808 = vmatpush.msra.mxu2 %v766_v26 }
  0x26   : > { %794 = vmatpush.msra.mxu1 %v753_v32  ;;  %736 = vmatpush.msra.mxu0 %v711_v33  ;;  %v760_v32 = vld [vmem:[%s2613_s7 + $0x78] sm:$0xff]  ;;  %v758_v33 = vld [vmem:[%s2613_s7 + $0x68] sm:$0xff] }
  0x27   : > { %809 = vmatpush.msra.mxu2 %v764_v27 }
  0x28   : > { %795 = vmatpush.msra.mxu1 %v751_v34  ;;  %737 = vmatpush.msra.mxu0 %v710_v36  ;;  %v756_v34 = vld [vmem:[%s2613_s7 + $0x58] sm:$0xff] }
  0x29   : > { %810 = vmatpush.msra.mxu2 %v762_v30  ;;  %v985_v30 = vld [vmem:[%s2619_s13 + $0x68] sm:$0xff] }
  0x2a   : > { %796 = vmatpush.msra.mxu1 %v749_v35  ;;  %738 = vmatpush.msra.mxu0 %v709_v37  ;;  %v754_v37 = vld [vmem:[%s2613_s7 + $0x48] sm:$0xff] }
  0x2b   : > { %811 = vmatpush.msra.mxu2 %v760_v32  ;;  %v983_v32 = vld [vmem:[%s2619_s13 + $0x58] sm:$0xff] }
  0x2c   : > { %797 = vmatpush.msra.mxu1 %v747_v38  ;;  %739 = vmatpush.msra.mxu0 %v708_v39 }
  0x2d   : > { %812 = vmatpush.msra.mxu2 %v758_v33  ;;  %v982_v33 = vld [vmem:[%s2619_s13 + $0x50] sm:$0xff] }
  0x2e   : > { %798 = vmatpush.msra.mxu1 %v745_v40  ;;  %740 = vmatpush.msra.mxu0 %v707_v41  ;;  %v752_v40 = vld [vmem:[%s2613_s7 + $0x38] sm:$0xff] }
  0x2f   : > { %799 = vmatmul.f32.vlgmr.msra.gmra.mxu1 %v1846_v0  ;;  %813 = vmatpush.msra.mxu2 %v756_v34  ;;  %v981_v34 = vld [vmem:[%s2619_s13 + $0x48] sm:$0xff] }
  0x31   : > { %814 = vmatpush.msra.mxu2 %v754_v37  ;;  %v978_v37 = vld [vmem:[%s2619_s13 + $0x30] sm:$0xff] }
  0x33   : > { %815 = vmatpush.msra.mxu2 %v752_v40  ;;  %v975_v40 = vld [vmem:[%s2619_s13 + $0x18] sm:$0xff] }
  0x86   : > { %v683_v10 = vpop.xlane.xlu0 %682 }
  0x87   : > { %v684_v11 = vmul.f32 0.03125, %v683_v10  ;;  %v665_v10 = vand.u32 7, %v653_v7  ;;  %v909_v7 = vld [vmem:[%s2615_s9 + $0x18] sm:$0xff] }
  0x89   : > { %v685_v14 = vsub.f32 %v1846_v0, %v684_v11  ;;  %vm1994_vm7 = vcmp.le.s32.totalorder %v1871_v9, %v665_v10  ;;  %v908_v10 = vld [vmem:[%s2615_s9 + $0x10] sm:$0xff] }
  0x8b   : > { %v1881_v15 = vmul.f32 %v1877_v13, %v685_v14 }
  0x8d   : > { %v687_v16 = vmul.f32 %v1881_v15, %v1881_v15 }
  0x8f   : > { %688 = vadd.xlane.f32.xlu0 %v687_v16  ;;  %v658_v16 = vand.u32 7, %v652_v5  ;;  %v911_v5 = vld [vmem:[%s2615_s9 + $0x28] sm:$0xff] }
  0x91   : > { %vm2002_vm9 = vcmp.le.s32.totalorder %v1871_v9, %v658_v16 }
  0xac   : > { %v800_v59 = vpop.f32.mrf.mxu1 }
  0xad   : > { %v801_v60 = vadd.f32 %v800_v59, %v779_v58  ;;  %v918_v58 = vld [vmem:[%s2615_s9 + $0x60] sm:$0xff]  ;;  %v917_v59 = vld [vmem:[%s2615_s9 + $0x58] sm:$0xff] }
  0xaf   : > { %842 = vmatpush.xpose.msrb.mxu0 %v801_v60  ;;  %v916_v60 = vld [vmem:[%s2615_s9 + $0x50] sm:$0xff] }
 0x102   : > { %v689_v42 = vpop.xlane.xlu0 %688 }
 0x103   : > { %v690_v43 = vmul.f32 0.03125, %v689_v42  ;;  %v750_v42 = vld [vmem:[%s2613_s7 + $0x28] sm:$0xff] }
 0x104   : > { %816 = vmatpush.msra.mxu2 %v750_v42  ;;  %v973_v42 = vld [vmem:[%s2619_s13 + $0x8] sm:$0xff] }
 0x105   : > { %v691_v44 = vadd.f32 1e-08, %v690_v43  ;;  %v748_v43 = vld [vmem:[%s2613_s7 + $0x18] sm:$0xff] }
 0x106   : > { %817 = vmatpush.msra.mxu2 %v748_v43  ;;  %v972_v43 = vld [vmem:[%s2619_s13] sm:$0xff] }
 0x107   : > { %1694 = vrsqrt.f32 %v691_v44  ;;  %vm698_vm2 = vweird.f32 %v691_v44 }
 0x10d   : > { %v1695_v45 = vpop.eup %1694 }
 0x10e   : > { %v693_v46 = vmul.f32 %v1695_v45, %v691_v44  ;;  %vm699_vm1 = vweird.f32 %v1695_v45  ;;  %v746_v44 = vld [vmem:[%s2613_s7 + $0x8] sm:$0xff] }
 0x10f   : > { %vm700_vm3 = vmor %vm698_vm2, %vm699_vm1  ;;  %818 = vmatpush.msra.mxu2 %v746_v44  ;;  %v1026_v44 = vld [vmem:[%s2621_s15 + $0x78] sm:$0xff] }
 0x110   : > { %v694_v47 = vmul.f32 %v1695_v45, %v693_v46  ;;  %819 = vmatmul.f32.vlgmr.msra.gmra.mxu2 %v1846_v0  ;;  %v921_v0 = vld [vmem:[%s2615_s9 + $0x78] sm:$0xff]  ;;  %1029 = vmatpush.msrb.mxu1 %v1026_v44 }
 0x112   : > { %v695_v48 = vmul.f32 0.5, %v694_v47 }
 0x114   : > { %v696_v49 = vsub.f32 1.5, %v695_v48 }
 0x116   : > { %v697_v50 = vmul.f32 %v1695_v45, %v696_v49 }
 0x118   : > { %v701_v52 = vsel %vm700_vm3, %v1695_v45, %v697_v50  ;;  %v780_v50 = vperm.slane %v1974_v57, 1  ;;  %v919_v57 = vld [vmem:[%s2615_s9 + $0x68] sm:$0xff] }
 0x119   : > { %v702_v53 = vmul.f32 %v701_v52, %v1881_v15 }
 0x11b   : > { %v704_v55 = vmul.f32 %v1676_v51, %v702_v53 }
 0x11d   : > { %v1968_v56 = vadd.f32 %v1677_v54, %v704_v55  ;;  %v920_v55 = vld [vmem:[%s2615_s9 + $0x70] sm:$0xff] }
 0x11f   : > { %741 = vmatmul.f32.vlgmr.msra.gmra.mxu0 %v1968_v56 }
 0x120   : > { %990 = vmatpush.msra.mxu0 %v987_v24  ;;  %v1605_v24 = vld [vmem:[%s2613_s7 + $0x1c0] sm:$0xff] }
 0x122   : > { %991 = vmatpush.msra.mxu0 %v986_v25  ;;  %v1606_v25 = vld [vmem:[%s2613_s7 + $0x1c8] sm:$0xff] }
 0x124   : > { %992 = vmatpush.msra.mxu0 %v985_v30  ;;  %v1600_v30 = vld [vmem:[%s2613_s7 + $0x198] sm:$0xff] }
 0x193   : > { %v820_v51 = vpop.f32.mrf.mxu2 }
 0x194   : > { %v821_v52 = vadd.f32 %v820_v51, %v780_v50  ;;  %v1022_v51 = vld [vmem:[%s2621_s15 + $0x58] sm:$0xff] }
 0x196   : > { %v826_v53 = vmul.f32 %v1989_v3, %v821_v52  ;;  %v825_v54 = vmul.f32 %v1982_v62, %v821_v52  ;;  %v1021_v52 = vld [vmem:[%s2621_s15 + $0x50] sm:$0xff] }
 0x198   : > { %900 = vmatpush.msra.mxu3 %v826_v53  ;;  %v1020_v53 = vld [vmem:[%s2621_s15 + $0x48] sm:$0xff] }
 0x19a   : > { %901 = vmatpush.msra.mxu3 %v825_v54  ;;  %v1019_v54 = vld [vmem:[%s2621_s15 + $0x40] sm:$0xff] }
 0x19c   : > { %v742_v63 = vpop.f32.mrf.mxu0  ;;  %924 = vmatpush.msrb.mxu3 %v921_v0 }
 0x19d   : > { %v743_v1 = vadd.f32 %v1678_v61, %v742_v63  ;;  %v915_v61 = vld [vmem:[%s2615_s9 + $0x48] sm:$0xff]  ;;  %v914_v63 = vld [vmem:[%s2615_s9 + $0x40] sm:$0xff] }
 0x19e   : > { %925 = vmatpush.msrb.mxu3 %v920_v55  ;;  %v1018_v55 = vld [vmem:[%s2621_s15 + $0x38] sm:$0xff] }
 0x19f   : > { %v823_v2 = vmul.f32 %v1982_v62, %v743_v1  ;;  %v824_v4 = vmul.f32 %v1989_v3, %v743_v1  ;;  %v913_v1 = vld [vmem:[%s2615_s9 + $0x38] sm:$0xff] }
 0x1a0   : > { %926 = vmatpush.msrb.mxu3 %v919_v57 }
 0x1a1   : > { %843 = vmatmul.f32.vlgmr.msrb.gmra.mxu0 %v823_v2  ;;  %v912_v2 = vld [vmem:[%s2615_s9 + $0x30] sm:$0xff] }
 0x1a2   : > { %927 = vmatpush.msrb.mxu3 %v918_v58  ;;  %v1017_v58 = vld [vmem:[%s2621_s15 + $0x30] sm:$0xff] }
 0x1a4   : > { %928 = vmatpush.msrb.mxu3 %v917_v59 }
 0x1a6   : > { %929 = vmatpush.msrb.mxu3 %v916_v60  ;;  %v1016_v60 = vld [vmem:[%s2621_s15 + $0x28] sm:$0xff] }
 0x1a8   : > { %930 = vmatpush.msrb.mxu3 %v915_v61 }
 0x1a9   : > { %846 = vmatmul.f32.gmra.mxu0 %v824_v4 }
 0x1aa   : > { %931 = vmatpush.msrb.mxu3 %v914_v63  ;;  %v1015_v63 = vld [vmem:[%s2621_s15 + $0x20] sm:$0xff] }
 0x1ac   : > { %932 = vmatpush.msrb.mxu3 %v913_v1 }
 0x1ae   : > { %933 = vmatpush.msrb.mxu3 %v912_v2  ;;  %v1014_v2 = vld [vmem:[%s2621_s15 + $0x18] sm:$0xff] }
 0x1b0   : > { %934 = vmatpush.msrb.mxu3 %v911_v5  ;;  %v1680_v5 = vld [vmem:[%s2617_s11] ss:$0 sm:$0xff] }
 0x21e   : > { %v844_v6 = vpop.f32.mrf.mxu0 }
 0x21f   : > { %v850_v18 = vmul.f32 0.25, %v844_v6  ;;  %v910_v6 = vld [vmem:[%s2615_s9 + $0x20] sm:$0xff] }
 0x220   : > { %935 = vmatpush.msrb.mxu3 %v910_v6 }
 0x221   : > { %v852_v19 = vsel %vm2002_vm9, %v850_v18, -1e+30  ;;  %v906_v18 = vld [vmem:[%s2615_s9] sm:$0xff] }
 0x222   : > { %v855_v20 = vsel %vm854_vm8, %v852_v19, -inf  ;;  %936 = vmatpush.msrb.mxu3 %v909_v7 }
 0x224   : > { %937 = vmatpush.msrb.mxu3 %v908_v10  ;;  %v1681_v10 = vld [vmem:[%s2618_s12] ss:$0 sm:$0xff] }
 0x226   : > { %v847_v11 = vpop.f32.mrf.mxu0 }
 0x227   : > { %v851_v15 = vmul.f32 0.25, %v847_v11 }
 0x229   : > { %v853_v12 = vsel %vm1994_vm7, %v851_v15, -1e+30  ;;  %v907_v15 = vld [vmem:[%s2615_s9 + $0x8] sm:$0xff] }
 0x22a   : > { %v858_v17 = vsel %vm854_vm8, %v853_v12, -inf  ;;  %938 = vmatpush.msrb.mxu3 %v907_v15 }
 0x22b   : > { %859 = vmax.xlane.f32.xlu1 %v858_v17 }
 0x22c   : > { %939 = vmatpush.msrb.mxu3 %v906_v18  ;;  %v1611_v18 = vld [vmem:[%s2613_s7 + $0x1f0] sm:$0xff] }
 0x233   : > { %856 = vmax.xlane.f32.xlu1 %v855_v20  ;;  %v1679_v20 = vld [vmem:[%s2616_s10] ss:$0 sm:$0xff] }
 0x29e   : > { %v860_v28 = vpop.xlane.xlu1 %859 }
 0x29f   : > { %v862_v29 = vsub.f32 %v853_v12, %v860_v28 }
 0x2a1   : > { %v865_v31 = vmul.f32 1.442695, %v862_v29 }
 0x2a3   : > { %1696 = vpow2.f32 %v865_v31  ;;  %v984_v31 = vld [vmem:[%s2619_s13 + $0x60] sm:$0xff] }
 0x2a4   : > { %993 = vmatpush.msra.mxu0 %v984_v31  ;;  %v1597_v31 = vld [vmem:[%s2613_s7 + $0x180] sm:$0xff] }
 0x2a6   : > { %v857_v35 = vpop.xlane.xlu1 %856  ;;  %994 = vmatpush.msra.mxu0 %v983_v32  ;;  %v1598_v32 = vld [vmem:[%s2613_s7 + $0x188] sm:$0xff] }
 0x2a7   : > { %v861_v36 = vsub.f32 %v852_v19, %v857_v35  ;;  %v980_v35 = vld [vmem:[%s2619_s13 + $0x40] sm:$0xff] }
 0x2a8   : > { %995 = vmatpush.msra.mxu0 %v982_v33  ;;  %v1595_v33 = vld [vmem:[%s2613_s7 + $0x170] sm:$0xff] }
 0x2a9   : > { %v1697_v38 = vpop.eup %1696  ;;  %v863_v39 = vmul.f32 1.442695, %v861_v36  ;;  %v979_v36 = vld [vmem:[%s2619_s13 + $0x38] sm:$0xff] }
 0x2aa   : > { %v870_v41 = vsel %vm854_vm8, %v1697_v38, 0.0  ;;  %996 = vmatpush.msra.mxu0 %v981_v34  ;;  %v1596_v34 = vld [vmem:[%s2613_s7 + $0x178] sm:$0xff] }
 0x2ab   : > { %1698 = vpow2.f32 %v863_v39  ;;  %871 = vadd.xlane.f32.xlu2 %v870_v41  ;;  %v976_v39 = vld [vmem:[%s2619_s13 + $0x20] sm:$0xff]  ;;  %v974_v41 = vld [vmem:[%s2619_s13 + $0x10] sm:$0xff] }
 0x2ac   : > { %997 = vmatpush.msra.mxu0 %v980_v35  ;;  %v1593_v35 = vld [vmem:[%s2613_s7 + $0x160] sm:$0xff] }
 0x2ae   : > { %998 = vmatpush.msra.mxu0 %v979_v36  ;;  %v1594_v36 = vld [vmem:[%s2613_s7 + $0x168] sm:$0xff] }
 0x2b0   : > { %999 = vmatpush.msra.mxu0 %v978_v37  ;;  %v1591_v37 = vld [vmem:[%s2613_s7 + $0x150] sm:$0xff] }
 0x2b1   : > { %v1699_v45 = vpop.eup %1698 }
 0x2b2   : > { %v867_v46 = vsel %vm854_vm8, %v1699_v45, 0.0 }
 0x2b3   : > { %868 = vadd.xlane.f32.xlu2 %v867_v46  ;;  %v1024_v46 = vld [vmem:[%s2621_s15 + $0x68] sm:$0xff] }
 0x31e   : > { %v872_v47 = vpop.xlane.xlu2 %871 }
 0x31f   : > { %1700 = vrcp.f32 %v872_v47 }
 0x325   : > { %v1701_v48 = vpop.eup %1700 }
 0x326   : > { %v876_v49 = vmul.f32 %v1701_v48, %v1697_v38  ;;  %v869_v4 = vpop.xlane.xlu2 %868  ;;  %v977_v38 = vld [vmem:[%s2619_s13 + $0x28] sm:$0xff] }
 0x327   : > { %1702 = vrcp.f32 %v869_v4  ;;  %1000 = vmatpush.msra.mxu0 %v977_v38  ;;  %v1592_v38 = vld [vmem:[%s2613_s7 + $0x158] sm:$0xff] }
 0x328   : > { %878 = vrot.lane.b32.xlu0 %v876_v49, %s1729_s23  ;;  %v1023_v49 = vld [vmem:[%s2621_s15 + $0x60] sm:$0xff] }
 0x329   : > { %1001 = vmatpush.msra.mxu0 %v976_v39  ;;  %v1589_v39 = vld [vmem:[%s2613_s7 + $0x140] sm:$0xff] }
 0x32b   : > { %1002 = vmatpush.msra.mxu0 %v975_v40  ;;  %v1590_v40 = vld [vmem:[%s2613_s7 + $0x148] sm:$0xff] }
 0x32d   : > { %v1703_v11 = vpop.eup %1702  ;;  %1003 = vmatpush.msra.mxu0 %v974_v41  ;;  %v1682_v41 = vld [vmem:[%s2620_s14] ss:$0 sm:$0xff] }
 0x32e   : > { %v875_v16 = vmul.f32 %v1703_v11, %v1699_v45  ;;  %v1025_v45 = vld [vmem:[%s2621_s15 + $0x70] sm:$0xff] }
 0x32f   : > { %1004 = vmatpush.msra.mxu0 %v973_v42  ;;  %1030 = vmatpush.msrb.mxu1 %v1025_v45  ;;  %v1587_v45 = vld [vmem:[%s2613_s7 + $0x130] sm:$0xff] }
 0x331   : > { %1005 = vmatpush.msra.mxu0 %v972_v43  ;;  %1031 = vmatpush.msrb.mxu1 %v1024_v46  ;;  %v1588_v46 = vld [vmem:[%s2613_s7 + $0x138] sm:$0xff] }
 0x333   : > { %1032 = vmatpush.msrb.mxu1 %v1023_v49  ;;  %v1583_v49 = vld [vmem:[%s2613_s7 + $0x110] sm:$0xff] }
 0x335   : > { %1033 = vmatpush.msrb.mxu1 %v1022_v51  ;;  %v1581_v51 = vld [vmem:[%s2613_s7 + $0x100] sm:$0xff] }
 0x337   : > { %1034 = vmatpush.msrb.mxu1 %v1021_v52  ;;  %v1582_v52 = vld [vmem:[%s2613_s7 + $0x108] sm:$0xff] }
 0x339   : > { %1035 = vmatpush.msrb.mxu1 %v1020_v53  ;;  %v1580_v53 = vld [vmem:[%s2611_s5 + $0xf8] sm:$0xff] }
 0x33a   : > { %1097 = vmatpush.msrb.mxu2 %v1580_v53 }
 0x33b   : > { %1036 = vmatpush.msrb.mxu1 %v1019_v54  ;;  %v1579_v54 = vld [vmem:[%s2611_s5 + $0xf0] sm:$0xff] }
 0x33c   : > { %1098 = vmatpush.msrb.mxu2 %v1579_v54 }
 0x33d   : > { %1037 = vmatpush.msrb.mxu1 %v1018_v55  ;;  %v1577_v55 = vld [vmem:[%s2611_s5 + $0xe0] sm:$0xff] }
 0x33f   : > { %1038 = vmatpush.msrb.mxu1 %v1017_v58  ;;  %v1575_v58 = vld [vmem:[%s2611_s5 + $0xd0] sm:$0xff] }
 0x341   : > { %1039 = vmatpush.msrb.mxu1 %v1016_v60  ;;  %v1573_v60 = vld [vmem:[%s2611_s5 + $0xc0] sm:$0xff] }
 0x343   : > { %1040 = vmatpush.msrb.mxu1 %v1015_v63  ;;  %v1683_v63 = vld [vmem:[%s2622_s16] ss:$0 sm:$0xff] }
 0x345   : > { %1041 = vmatpush.msrb.mxu1 %v1014_v2 }
 0x39a   : > { %v879_v12 = vpop.permute.xlu0 %878 }
 0x39b   : > { %v881_v17 = vsel %vm854_vm8, %v875_v16, %v879_v12  ;;  %v1013_v16 = vld [vmem:[%s2621_s15 + $0x10] sm:$0xff]  ;;  %v1012_v12 = vld [vmem:[%s2621_s15 + $0x8] sm:$0xff] }
 0x39c   : > { %1564 = vmatmul.msk.f32.vlgmr.msra.gmra.mxu3 %vm882_vm10, %v881_v17  ;;  %1042 = vmatpush.msrb.mxu1 %v1013_v16  ;;  %v1011_v17 = vld [vmem:[%s2621_s15] sm:$0xff]  ;;  %v1567_v16 = vld [vmem:[%s2611_s5 + $0x90] sm:$0xff] }
 0x39d   : > { %1157 = vmatpush.msra.mxu3 %v1611_v18 }
 0x39e   : > { %1043 = vmatpush.msrb.mxu1 %v1012_v12  ;;  %v1566_v12 = vld [vmem:[%s2611_s5 + $0x88] sm:$0xff] }
 0x3a0   : > { %1044 = vmatpush.msrb.mxu1 %v1011_v17  ;;  %v1565_v17 = vld [vmem:[%s2611_s5 + $0x80] sm:$0xff] }
 0x41f   : > { %v903_v19 = vpop.f32.mrf.mxu3 }
 0x420   : > { %940 = vmatmul.f32.vlgmr.msrb.gmra.mxu3 %v903_v19  ;;  %v1612_v19 = vld [vmem:[%s2613_s7 + $0x1f8] sm:$0xff] }
 0x421   : > { %1177 = vmatpush.msrb.mxu0 %v1612_v19 }
 0x4a3   : > { %v941_v21 = vpop.f32.mrf.mxu3 }
 0x4a4   : > { %v942_v22 = vadd.f32 %v1679_v20, %v941_v21  ;;  %v1609_v20 = vld [vmem:[%s2613_s7 + $0x1e0] sm:$0xff]  ;;  %v1610_v21 = vld [vmem:[%s2613_s7 + $0x1e8] sm:$0xff] }
 0x4a5   : > { %1158 = vmatpush.msra.mxu3 %v1609_v20  ;;  %1178 = vmatpush.msrb.mxu0 %v1610_v21 }
 0x4a6   : > { %v944_v23 = vadd.f32 %v942_v22, %v1968_v56  ;;  %v1607_v22 = vld [vmem:[%s2613_s7 + $0x1d0] sm:$0xff] }
 0x4a7   : > { %1159 = vmatpush.msra.mxu3 %v1607_v22  ;;  %v1613_v22 = vld [vmem:[%s2614_s8 + $0x1] ss:$2 sm:$0x3] }
 0x4a8   : > { %947 = vadd.xlane.f32.xlu1 %v944_v23 }
 0x4a9   : > { %1160 = vmatpush.msra.mxu3 %v1605_v24  ;;  %v1154_v24 = vperm.slane %v1613_v22, 1 }
 0x51b   : > { %v948_v26 = vpop.xlane.xlu1 %947 }
 0x51c   : > { %v949_v27 = vmul.f32 0.03125, %v948_v26  ;;  %v1603_v26 = vld [vmem:[%s2613_s7 + $0x1b0] sm:$0xff] }
 0x51d   : > { %1161 = vmatpush.msra.mxu3 %v1603_v26 }
 0x51e   : > { %v950_v28 = vsub.f32 %v944_v23, %v949_v27  ;;  %v1608_v23 = vld [vmem:[%s2613_s7 + $0x1d8] sm:$0xff] }
 0x51f   : > { %1179 = vmatpush.msrb.mxu0 %v1608_v23  ;;  %v1604_v27 = vld [vmem:[%s2613_s7 + $0x1b8] sm:$0xff] }
 0x520   : > { %v2125_v29 = vmul.f32 %v1877_v13, %v950_v28  ;;  %v1601_v28 = vld [vmem:[%s2613_s7 + $0x1a0] sm:$0xff] }
 0x521   : > { %1180 = vmatpush.msrb.mxu0 %v1606_v25  ;;  %1162 = vmatpush.msra.mxu3 %v1601_v28 }
 0x522   : > { %v952_v56 = vmul.f32 %v2125_v29, %v2125_v29 }
 0x523   : > { %1181 = vmatpush.msrb.mxu0 %v1604_v27  ;;  %v1153_v27 = vperm.slane %v1613_v22, 0 }
 0x524   : > { %953 = vadd.xlane.f32.xlu2 %v952_v56  ;;  %v1599_v56 = vld [vmem:[%s2613_s7 + $0x190] sm:$0xff] }
 0x525   : > { %1163 = vmatpush.msra.mxu3 %v1599_v56 }
 0x527   : > { %1164 = vmatpush.msra.mxu3 %v1597_v31 }
 0x529   : > { %1165 = vmatpush.msra.mxu3 %v1595_v33 }
 0x52b   : > { %1166 = vmatpush.msra.mxu3 %v1593_v35 }
 0x52d   : > { %1167 = vmatpush.msra.mxu3 %v1591_v37 }
 0x52f   : > { %1168 = vmatpush.msra.mxu3 %v1589_v39 }
 0x531   : > { %1169 = vmatpush.msra.mxu3 %v1587_v45 }
 0x597   : > { %v954_v47 = vpop.xlane.xlu2 %953 }
 0x598   : > { %v955_v48 = vmul.f32 0.03125, %v954_v47  ;;  %v1585_v47 = vld [vmem:[%s2613_s7 + $0x120] sm:$0xff] }
 0x599   : > { %1170 = vmatpush.msra.mxu3 %v1585_v47 }
 0x59a   : > { %v956_v50 = vadd.f32 1e-08, %v955_v48  ;;  %v1586_v48 = vld [vmem:[%s2613_s7 + $0x128] sm:$0xff] }
 0x59b   : > { %1171 = vmatpush.msra.mxu3 %v1583_v49 }
 0x59c   : > { %1704 = vrsqrt.f32 %v956_v50  ;;  %vm963_vm12 = vweird.f32 %v956_v50 }
 0x59d   : > { %1172 = vmatpush.msra.mxu3 %v1581_v51 }
 0x5a2   : > { %v1705_v0 = vpop.eup %1704 }
 0x5a3   : > { %v958_v57 = vmul.f32 %v1705_v0, %v956_v50  ;;  %vm964_vm11 = vweird.f32 %v1705_v0  ;;  %v1584_v50 = vld [vmem:[%s2613_s7 + $0x118] sm:$0xff] }
 0x5a4   : > { %vm965_vm13 = vmor %vm963_vm12, %vm964_vm11 }
 0x5a5   : > { %v959_v59 = vmul.f32 %v1705_v0, %v958_v57  ;;  %v1576_v57 = vld [vmem:[%s2611_s5 + $0xd8] sm:$0xff] }
 0x5a7   : > { %v960_v61 = vmul.f32 0.5, %v959_v59  ;;  %v1574_v59 = vld [vmem:[%s2611_s5 + $0xc8] sm:$0xff] }
 0x5a9   : > { %v961_v1 = vsub.f32 1.5, %v960_v61  ;;  %v1572_v61 = vld [vmem:[%s2611_s5 + $0xb8] sm:$0xff] }
 0x5ab   : > { %v962_v4 = vmul.f32 %v1705_v0, %v961_v1 }
 0x5ad   : > { %v966_v6 = vsel %vm965_vm13, %v1705_v0, %v962_v4  ;;  %v1578_v0 = vld [vmem:[%s2611_s5 + $0xe8] sm:$0xff]  ;;  %v2363_v4 = vld [vmem:[%s625_s25] sm:$0xff] }
 0x5ae   : > { %v967_v7 = vmul.f32 %v966_v6, %v2125_v29  ;;  %v1602_v29 = vld [vmem:[%s2613_s7 + $0x1a8] sm:$0xff]  ;;  %1099 = vmatpush.msrb.mxu2 %v1578_v0 }
 0x5af   : > { %1182 = vmatpush.msrb.mxu0 %v1602_v29 }
 0x5b0   : > { %v969_v11 = vmul.f32 %v1680_v5, %v967_v7  ;;  %1100 = vmatpush.msrb.mxu2 %v1577_v55  ;;  %v1571_v7 = vld [vmem:[%s2611_s5 + $0xb0] sm:$0xff] }
 0x5b1   : > { %1183 = vmatpush.msrb.mxu0 %v1600_v30 }
 0x5b2   : > { %v2217_v15 = vadd.f32 %v1681_v10, %v969_v11  ;;  %1101 = vmatpush.msrb.mxu2 %v1576_v57  ;;  %v1570_v10 = vld [vmem:[%s2611_s5 + $0xa8] sm:$0xff]  ;;  %v1569_v11 = vld [vmem:[%s2611_s5 + $0xa0] sm:$0xff] }
 0x5b3   : > { %1184 = vmatpush.msrb.mxu0 %v1598_v32 }
 0x5b4   : > { %1006 = vmatmul.f32.vlgmr.msra.gmra.mxu0 %v2217_v15  ;;  %1102 = vmatpush.msrb.mxu2 %v1575_v58 }
 0x5b5   : > { %1185 = vmatpush.msrb.mxu0 %v1596_v34 }
 0x5b6   : > { %1103 = vmatpush.msrb.mxu2 %v1574_v59 }
 0x5b7   : > { %1186 = vmatpush.msrb.mxu0 %v1594_v36 }
 0x5b8   : > { %1104 = vmatpush.msrb.mxu2 %v1573_v60 }
 0x5b9   : > { %1187 = vmatpush.msrb.mxu0 %v1592_v38 }
 0x5ba   : > { %1105 = vmatpush.msrb.mxu2 %v1572_v61 }
 0x5bb   : > { %1188 = vmatpush.msrb.mxu0 %v1590_v40  ;;  %v1684_v40 = vld [vmem:[%s2632_s28 + $0x1] ss:$0 sm:$0xff] }
 0x5bc   : > { %1106 = vmatpush.msrb.mxu2 %v1571_v7 }
 0x5bd   : > { %1189 = vmatpush.msrb.mxu0 %v1588_v46  ;;  %v1686_v46 = vld [vmem:[%s2612_s6 + $0x1] ss:$0 sm:$0xff] }
 0x5be   : > { %1107 = vmatpush.msrb.mxu2 %v1570_v10  ;;  %v1630_v10 = vld [vmem:[%s2615_s9 + $0xf8] sm:$0xff] }
 0x5bf   : > { %1190 = vmatpush.msrb.mxu0 %v1586_v48 }
 0x5c0   : > { %1108 = vmatpush.msrb.mxu2 %v1569_v11  ;;  %v1629_v11 = vld [vmem:[%s2615_s9 + $0xf0] sm:$0xff] }
 0x5c1   : > { %1191 = vmatpush.msrb.mxu0 %v1584_v50 }
 0x5c3   : > { %1192 = vmatpush.msrb.mxu0 %v1582_v52 }
 0x631   : > { %v1007_v42 = vpop.f32.mrf.mxu0 }
 0x632   : > { %v1008_v43 = vadd.f32 %v1682_v41, %v1007_v42 }
 0x634   : > { %v1010_v44 = vmax.f32 %v1008_v43, 0.0  ;;  %v1685_v43 = vld [vmem:[%s2610_s4 + $0x1] ss:$0 sm:$0xff] }
 0x636   : > { %1045 = vmatmul.f32.vlgmr.msrb.gmra.mxu1 %v1010_v44 }
 0x6b3   : > { %v1046_v1 = vpop.f32.mrf.mxu1 }
 0x6b4   : > { %v1047_v2 = vadd.f32 %v1683_v63, %v1046_v1 }
 0x6b6   : > { %v1049_v5 = vadd.f32 %v1047_v2, %v2217_v15  ;;  %v1568_v15 = vld [vmem:[%s2611_s5 + $0x98] sm:$0xff] }
 0x6b7   : > { %1109 = vmatpush.msrb.mxu2 %v1568_v15  ;;  %v1628_v15 = vld [vmem:[%s2615_s9 + $0xe8] sm:$0xff] }
 0x6b8   : > { %v1050_v6 = vmul.f32 %v1049_v5, %v2363_v4 }
 0x6b9   : > { %1110 = vmatpush.msrb.mxu2 %v1567_v16  ;;  %v1627_v16 = vld [vmem:[%s2615_s9 + $0xe0] sm:$0xff] }
 0x6ba   : > { %1053 = vadd.xlane.f32.xlu1 %v1050_v6  ;;  %1173 = vmatmul.f32.vlgmr.msra.gmra.mxu3 %v1050_v6 }
 0x6bb   : > { %1193 = vmatmul.f32.vlgmr.msrb.gmra.mxu0 %v1050_v6  ;;  %1111 = vmatpush.msrb.mxu2 %v1566_v12  ;;  %v1626_v12 = vld [vmem:[%s2615_s9 + $0xd8] sm:$0xff] }
 0x6bd   : > { %1112 = vmatpush.msrb.mxu2 %v1565_v17  ;;  %v1625_v17 = vld [vmem:[%s2615_s9 + $0xd0] sm:$0xff] }
 0x72d   : > { %v1054_v18 = vpop.xlane.xlu1 %1053 }
 0x72e   : > { %v1055_v19 = vmul.f32 0.03125, %v1054_v18  ;;  %v1624_v18 = vld [vmem:[%s2615_s9 + $0xc8] sm:$0xff] }
 0x730   : > { %v1056_v20 = vsub.f32 %v1050_v6, %v1055_v19  ;;  %v1623_v19 = vld [vmem:[%s2615_s9 + $0xc0] sm:$0xff] }
 0x732   : > { %v1057_v21 = vmul.f32 %v1877_v13, %v1056_v20  ;;  %v1622_v20 = vld [vmem:[%s2615_s9 + $0xb8] sm:$0xff] }
 0x734   : > { %v1058_v23 = vmul.f32 %v1057_v21, %v1057_v21 }
 0x736   : > { %1059 = vadd.xlane.f32.xlu2 %v1058_v23  ;;  %v1620_v23 = vld [vmem:[%s2615_s9 + $0xa8] sm:$0xff] }
 0x738   : > { %v1194_v25 = vpop.f32.mrf.mxu0 }
 0x739   : > { %v1195_v26 = vadd.f32 %v1194_v25, %v1154_v24  ;;  %v1619_v24 = vld [vmem:[%s2615_s9 + $0xa0] sm:$0xff]  ;;  %v1618_v25 = vld [vmem:[%s2615_s9 + $0x98] sm:$0xff] }
 0x73b   : > { %v1200_v28 = vmul.f32 %v1989_v3, %v1195_v26  ;;  %v1199_v29 = vmul.f32 %v1982_v62, %v1195_v26  ;;  %v1617_v26 = vld [vmem:[%s2615_s9 + $0x90] sm:$0xff] }
 0x73d   : > { %1272 = vmatpush.msra.mxu2 %v1200_v28  ;;  %v1174_v56 = vpop.f32.mrf.mxu3  ;;  %v1616_v28 = vld [vmem:[%s2615_s9 + $0x88] sm:$0xff] }
 0x73e   : > { %v1175_v30 = vadd.f32 %v1174_v56, %v1153_v27 }
 0x73f   : > { %1273 = vmatpush.msra.mxu2 %v1199_v29 }
 0x740   : > { %1216 = vmatpush.xpose.msra.mxu1 %v1175_v30 }
 0x744   : > { %1297 = vmatpush.msrb.mxu1 %v1630_v10  ;;  %v1653_v10 = vld [vmem:[%s2621_s15 + $0xb0] sm:$0xff] }
 0x746   : > { %1298 = vmatpush.msrb.mxu1 %v1629_v11 }
 0x748   : > { %1299 = vmatpush.msrb.mxu1 %v1628_v15  ;;  %v1652_v15 = vld [vmem:[%s2621_s15 + $0xa8] sm:$0xff] }
 0x74a   : > { %1300 = vmatpush.msrb.mxu1 %v1627_v16 }
 0x74c   : > { %1301 = vmatpush.msrb.mxu1 %v1626_v12  ;;  %v1651_v12 = vld [vmem:[%s2621_s15 + $0xa0] sm:$0xff] }
 0x74e   : > { %1302 = vmatpush.msrb.mxu1 %v1625_v17 }
 0x750   : > { %1303 = vmatpush.msrb.mxu1 %v1624_v18  ;;  %v1650_v18 = vld [vmem:[%s2621_s15 + $0x98] sm:$0xff] }
 0x752   : > { %1304 = vmatpush.msrb.mxu1 %v1623_v19 }
 0x754   : > { %1305 = vmatpush.msrb.mxu1 %v1622_v20  ;;  %v1688_v20 = vld [vmem:[%s2617_s11 + $0x1] ss:$0 sm:$0xff] }
 0x7a9   : > { %v1060_v31 = vpop.xlane.xlu2 %1059 }
 0x7aa   : > { %v1061_v32 = vmul.f32 0.03125, %v1060_v31  ;;  %v1615_v31 = vld [vmem:[%s2615_s9 + $0x80] sm:$0xff] }
 0x7ac   : > { %v1062_v33 = vadd.f32 1e-08, %v1061_v32 }
 0x7ae   : > { %1706 = vrsqrt.f32 %v1062_v33  ;;  %vm1069_vm15 = vweird.f32 %v1062_v33 }
 0x7b4   : > { %v1707_v34 = vpop.eup %1706 }
 0x7b5   : > { %v1064_v35 = vmul.f32 %v1707_v34, %v1062_v33  ;;  %vm1070_vm14 = vweird.f32 %v1707_v34  ;;  %v1687_v33 = vld [vmem:[%s2616_s10 + $0x1] ss:$0 sm:$0xff] }
 0x7b6   : > { %vm1071_vm0 = vmor %vm1069_vm15, %vm1070_vm14 }
 0x7b7   : > { %v1065_v36 = vmul.f32 %v1707_v34, %v1064_v35 }
 0x7b9   : > { %v1066_v37 = vmul.f32 0.5, %v1065_v36 }
 0x7bb   : > { %v1067_v38 = vsub.f32 1.5, %v1066_v37  ;;  %v1646_v37 = vld [vmem:[%s2619_s13 + $0xf8] sm:$0xff] }
 0x7bd   : > { %v1068_v39 = vmul.f32 %v1707_v34, %v1067_v38  ;;  %v1645_v38 = vld [vmem:[%s2619_s13 + $0xf0] sm:$0xff] }
 0x7bf   : > { %v1072_v41 = vsel %vm1071_vm0, %v1707_v34, %v1068_v39 }
 0x7c0   : > { %v1073_v42 = vmul.f32 %v1072_v41, %v1057_v21  ;;  %v1621_v21 = vld [vmem:[%s2615_s9 + $0xb0] sm:$0xff] }
 0x7c1   : > { %1306 = vmatpush.msrb.mxu1 %v1621_v21 }
 0x7c2   : > { %v1075_v44 = vmul.f32 %v1684_v40, %v1073_v42 }
 0x7c3   : > { %1307 = vmatpush.msrb.mxu1 %v1620_v23  ;;  %v1689_v23 = vld [vmem:[%s2618_s12 + $0x1] ss:$0 sm:$0xff] }
 0x7c4   : > { %v2400_v45 = vadd.f32 %v1685_v43, %v1075_v44  ;;  %v1644_v44 = vld [vmem:[%s2619_s13 + $0xe8] sm:$0xff] }
 0x7c5   : > { %1308 = vmatpush.msrb.mxu1 %v1619_v24 }
 0x7c6   : > { %1113 = vmatmul.f32.vlgmr.msrb.gmra.mxu2 %v2400_v45 }
 0x7c7   : > { %1309 = vmatpush.msrb.mxu1 %v1618_v25  ;;  %1364 = vmatpush.msrb.mxu2 %v1646_v37 }
 0x7c9   : > { %1310 = vmatpush.msrb.mxu1 %v1617_v26  ;;  %1365 = vmatpush.msrb.mxu2 %v1645_v38  ;;  %v1649_v26 = vld [vmem:[%s2621_s15 + $0x90] sm:$0xff] }
 0x7cb   : > { %1311 = vmatpush.msrb.mxu1 %v1616_v28  ;;  %1366 = vmatpush.msrb.mxu2 %v1644_v44  ;;  %v1647_v28 = vld [vmem:[%s2621_s15 + $0x80] sm:$0xff] }
 0x7cd   : > { %1312 = vmatpush.msrb.mxu1 %v1615_v31 }
 0x849   : > { %v1114_v47 = vpop.f32.mrf.mxu2 }
 0x84a   : > { %v1115_v48 = vadd.f32 %v1686_v46, %v1114_v47  ;;  %v1642_v46 = vld [vmem:[%s2619_s13 + $0xd8] sm:$0xff]  ;;  %v1641_v47 = vld [vmem:[%s2619_s13 + $0xd0] sm:$0xff] }
 0x84c   : > { %v1197_v49 = vmul.f32 %v1982_v62, %v1115_v48  ;;  %v1198_v50 = vmul.f32 %v1989_v3, %v1115_v48  ;;  %v1640_v48 = vld [vmem:[%s2619_s13 + $0xc8] sm:$0xff] }
 0x84e   : > { %1217 = vmatmul.f32.vlgmr.msra.gmra.mxu1 %v1197_v49  ;;  %v1639_v49 = vld [vmem:[%s2619_s13 + $0xc0] sm:$0xff] }
 0x856   : > { %1220 = vmatmul.f32.gmra.mxu1 %v1198_v50  ;;  %v1638_v50 = vld [vmem:[%s2619_s13 + $0xb8] sm:$0xff] }
 0x8cb   : > { %v1218_v51 = vpop.f32.mrf.mxu1 }
 0x8cc   : > { %v1224_v52 = vmul.f32 0.25, %v1218_v51  ;;  %v1637_v51 = vld [vmem:[%s2619_s13 + $0xb0] sm:$0xff] }
 0x8ce   : > { %v1226_v53 = vsel %vm2002_vm9, %v1224_v52, -1e+30  ;;  %v1636_v52 = vld [vmem:[%s2619_s13 + $0xa8] sm:$0xff] }
 0x8cf   : > { %v1228_v54 = vsel %vm854_vm8, %v1226_v53, -inf }
 0x8d0   : > { %1229 = vmax.xlane.f32.xlu2 %v1228_v54  ;;  %v1634_v54 = vld [vmem:[%s2619_s13 + $0x98] sm:$0xff] }
 0x8d3   : > { %v1221_v0 = vpop.f32.mrf.mxu1 }
 0x8d4   : > { %v1225_v55 = vmul.f32 0.25, %v1221_v0  ;;  %v1633_v0 = vld [vmem:[%s2619_s13 + $0x90] sm:$0xff] }
 0x8d6   : > { %v1227_v57 = vsel %vm1994_vm7, %v1225_v55, -1e+30  ;;  %v1632_v55 = vld [vmem:[%s2619_s13 + $0x88] sm:$0xff]  ;;  %vm1469_vm7 = vcmask 1041409  }
 0x8d7   : > { %v1231_v58 = vsel %vm854_vm8, %v1227_v57, -inf }
 0x8d8   : > { %1232 = vmax.xlane.f32.xlu1 %v1231_v58  ;;  %v1662_v58 = vld [vmem:[%s2621_s15 + $0xf8] sm:$0xff] }
 0x8d9   : > { %1404 = vmatpush.msrb.mxu3 %v1662_v58 }
 0x943   : > { %v1230_v62 = vpop.xlane.xlu2 %1229 }
 0x944   : > { %v1234_v59 = vsub.f32 %v1226_v53, %v1230_v62  ;;  %v1635_v53 = vld [vmem:[%s2619_s13 + $0xa0] sm:$0xff]  ;;  %v1661_v62 = vld [vmem:[%s2621_s15 + $0xf0] sm:$0xff] }
 0x945   : > { %1405 = vmatpush.msrb.mxu3 %v1661_v62 }
 0x946   : > { %v1236_v3 = vmul.f32 1.442695, %v1234_v59  ;;  %v1660_v59 = vld [vmem:[%s2621_s15 + $0xe8] sm:$0xff] }
 0x947   : > { %1406 = vmatpush.msrb.mxu3 %v1660_v59 }
 0x948   : > { %1708 = vpow2.f32 %v1236_v3 }
 0x94b   : > { %v1233_v60 = vpop.xlane.xlu1 %1232 }
 0x94c   : > { %v1235_v61 = vsub.f32 %v1227_v57, %v1233_v60  ;;  %v1631_v57 = vld [vmem:[%s2619_s13 + $0x80] sm:$0xff] }
 0x94e   : > { %v1709_v63 = vpop.eup %1708  ;;  %v1238_v8 = vmul.f32 1.442695, %v1235_v61  ;;  %v1659_v61 = vld [vmem:[%s2621_s15 + $0xe0] sm:$0xff] }
 0x94f   : > { %v1240_v1 = vsel %vm854_vm8, %v1709_v63, 0.0  ;;  %1407 = vmatpush.msrb.mxu3 %v1659_v61 }
 0x950   : > { %1710 = vpow2.f32 %v1238_v8  ;;  %1241 = vadd.xlane.f32.xlu1 %v1240_v1  ;;  %v1658_v8 = vld [vmem:[%s2621_s15 + $0xd8] sm:$0xff]  ;;  %v1657_v1 = vld [vmem:[%s2621_s15 + $0xd0] sm:$0xff] }
 0x951   : > { %1408 = vmatpush.msrb.mxu3 %v1658_v8 }
 0x953   : > { %1409 = vmatpush.msrb.mxu3 %v1657_v1 }
 0x956   : > { %v1711_v2 = vpop.eup %1710 }
 0x957   : > { %v1243_v5 = vsel %vm854_vm8, %v1711_v2, 0.0 }
 0x958   : > { %1244 = vadd.xlane.f32.xlu0 %v1243_v5  ;;  %v1655_v5 = vld [vmem:[%s2621_s15 + $0xc0] sm:$0xff] }
 0x9c3   : > { %v1242_v22 = vpop.xlane.xlu1 %1241 }
 0x9cb   : > { %v1245_v14 = vpop.xlane.xlu0 %1244 }
 0x9cc   : > { %1712 = vrcp.f32 %v1245_v14 }
 0x9cd   : > { %1714 = vrcp.f32 %v1242_v22 }
 0x9d2   : > { %v1713_v6 = vpop.eup %1712 }
 0x9d3   : > { %v1249_v7 = vmul.f32 %v1713_v6, %v1711_v2  ;;  %v1715_v27 = vpop.eup %1714  ;;  %v1656_v2 = vld [vmem:[%s2621_s15 + $0xc8] sm:$0xff]  ;;  %v1654_v6 = vld [vmem:[%s2621_s15 + $0xb8] sm:$0xff] }
 0x9d4   : > { %v1248_v29 = vmul.f32 %v1715_v27, %v1709_v63  ;;  %1410 = vmatpush.msrb.mxu3 %v1656_v2  ;;  %v1648_v27 = vld [vmem:[%s2621_s15 + $0x88] sm:$0xff] }
 0x9d5   : > { %1251 = vrot.lane.b32.xlu2 %v1249_v7, %s1729_s23 }
 0x9d6   : > { %1411 = vmatpush.msrb.mxu3 %v1655_v5 }
 0x9d8   : > { %1412 = vmatpush.msrb.mxu3 %v1654_v6 }
 0x9da   : > { %1413 = vmatpush.msrb.mxu3 %v1653_v10 }
 0x9dc   : > { %1414 = vmatpush.msrb.mxu3 %v1652_v15 }
 0x9de   : > { %1415 = vmatpush.msrb.mxu3 %v1651_v12 }
 0x9e0   : > { %1416 = vmatpush.msrb.mxu3 %v1650_v18 }
 0x9e2   : > { %1417 = vmatpush.msrb.mxu3 %v1649_v26 }
 0x9e4   : > { %1418 = vmatpush.msrb.mxu3 %v1648_v27 }
 0x9e6   : > { %1419 = vmatpush.msrb.mxu3 %v1647_v28 }
 0xa2f   : > { %v1252_v56 = vpop.permute.xlu2 %1251 }
 0xa30   : > { %v1254_v30 = vsel %vm854_vm8, %v1248_v29, %v1252_v56  ;;  %v1690_v29 = vld [vmem:[%s2620_s14 + $0x1] ss:$0 sm:$0xff]  ;;  %vm1472_vm8 = vcmask 58368  }
 0xa31   : > { %1614 = vmatmul.msk.f32.vlgmr.msra.gmra.mxu2 %vm882_vm10, %v1254_v30 }
 0xab4   : > { %v1275_v32 = vpop.f32.mrf.mxu2 }
 0xab5   : > { %1313 = vmatmul.f32.vlgmr.msrb.gmra.mxu1 %v1275_v32  ;;  %v1691_v32 = vld [vmem:[%s2622_s16 + $0x1] ss:$0 sm:$0xff] }
 0xb32   : > { %v1314_v34 = vpop.f32.mrf.mxu1 }
 0xb33   : > { %v1315_v35 = vadd.f32 %v1687_v33, %v1314_v34 }
 0xb35   : > { %v1317_v36 = vadd.f32 %v1315_v35, %v2400_v45  ;;  %v1643_v45 = vld [vmem:[%s2619_s13 + $0xe0] sm:$0xff] }
 0xb36   : > { %1367 = vmatpush.msrb.mxu2 %v1643_v45 }
 0xb37   : > { %1320 = vadd.xlane.f32.xlu1 %v1317_v36 }
 0xb38   : > { %1368 = vmatpush.msrb.mxu2 %v1642_v46 }
 0xb3a   : > { %1369 = vmatpush.msrb.mxu2 %v1641_v47 }
 0xb3c   : > { %1370 = vmatpush.msrb.mxu2 %v1640_v48 }
 0xb3e   : > { %1371 = vmatpush.msrb.mxu2 %v1639_v49 }
 0xb40   : > { %1372 = vmatpush.msrb.mxu2 %v1638_v50 }
 0xb42   : > { %1373 = vmatpush.msrb.mxu2 %v1637_v51 }
 0xb44   : > { %1374 = vmatpush.msrb.mxu2 %v1636_v52  ;;  %v1693_v52 = vld [vmem:[%s2624_s18] ss:$0 sm:$0xff] }
 0xb46   : > { %1375 = vmatpush.msrb.mxu2 %v1635_v53 }
 0xb48   : > { %1376 = vmatpush.msrb.mxu2 %v1634_v54  ;;  %v1458_v54 = vld [vmem:[%s630_s20 + $0x8] sm:$0xff] }
 0xb4a   : > { %1377 = vmatpush.msrb.mxu2 %v1633_v0  ;;  %v1457_v0 = vld [vmem:[%s630_s20] sm:$0xff] }
 0xb4c   : > { %1378 = vmatpush.msrb.mxu2 %v1632_v55 }
 0xb4e   : > { %1379 = vmatpush.msrb.mxu2 %v1631_v57 }
 0xbaa   : > { %v1321_v39 = vpop.xlane.xlu1 %1320 }
 0xbab   : > { %v1322_v40 = vmul.f32 0.03125, %v1321_v39 }
 0xbad   : > { %v1323_v41 = vsub.f32 %v1317_v36, %v1322_v40 }
 0xbaf   : > { %v2478_v42 = vmul.f32 %v1877_v13, %v1323_v41 }
 0xbb1   : > { %v1325_v43 = vmul.f32 %v2478_v42, %v2478_v42 }
 0xbb3   : > { %1326 = vadd.xlane.f32.xlu1 %v1325_v43 }
 0xc26   : > { %v1327_v3 = vpop.xlane.xlu1 %1326 }
 0xc27   : > { %v1328_v60 = vmul.f32 0.03125, %v1327_v3 }
 0xc29   : > { %v1329_v63 = vadd.f32 1e-08, %v1328_v60 }
 0xc2b   : > { %1716 = vrsqrt.f32 %v1329_v63  ;;  %vm1336_vm2 = vweird.f32 %v1329_v63 }
 0xc31   : > { %v1717_v14 = vpop.eup %1716 }
 0xc32   : > { %v1331_v7 = vmul.f32 %v1717_v14, %v1329_v63  ;;  %vm1337_vm1 = vweird.f32 %v1717_v14 }
 0xc33   : > { %vm1338_vm3 = vmor %vm1336_vm2, %vm1337_vm1 }
 0xc34   : > { %v1332_v11 = vmul.f32 %v1717_v14, %v1331_v7 }
 0xc36   : > { %v1333_v16 = vmul.f32 0.5, %v1332_v11 }
 0xc38   : > { %v1334_v17 = vsub.f32 1.5, %v1333_v16 }
 0xc3a   : > { %v1335_v19 = vmul.f32 %v1717_v14, %v1334_v17 }
 0xc3c   : > { %v1339_v21 = vsel %vm1338_vm3, %v1717_v14, %v1335_v19 }
 0xc3d   : > { %v1340_v22 = vmul.f32 %v1339_v21, %v2478_v42 }
 0xc3f   : > { %v1342_v24 = vmul.f32 %v1688_v20, %v1340_v22 }
 0xc41   : > { %v1344_v25 = vadd.f32 %v1689_v23, %v1342_v24 }
 0xc43   : > { %1380 = vmatmul.f32.vlgmr.msrb.gmra.mxu2 %v1344_v25 }
 0xcc6   : > { %v1381_v56 = vpop.f32.mrf.mxu2 }
 0xcc7   : > { %v1382_v30 = vadd.f32 %v1690_v29, %v1381_v56 }
 0xcc9   : > { %v1384_v31 = vmax.f32 %v1382_v30, 0.0 }
 0xccb   : > { %1420 = vmatmul.f32.vlgmr.msrb.gmra.mxu3 %v1384_v31 }
 0xd4e   : > { %v1421_v33 = vpop.f32.mrf.mxu3 }
 0xd4f   : > { %v1422_v34 = vadd.f32 %v1691_v32, %v1421_v33 }
 0xd51   : > { %v1424_v35 = vadd.f32 %v1422_v34, %v1344_v25 }
 0xd53   : > { %v1425_v36 = vmul.f32 %v1424_v35, %v2363_v4 }
 0xd55   : > { %1428 = vadd.xlane.f32.xlu1 %v1425_v36 }
 0xdc8   : > { %v1429_v37 = vpop.xlane.xlu1 %1428 }
 0xdc9   : > { %v1430_v38 = vmul.f32 0.03125, %v1429_v37 }
 0xdcb   : > { %v1431_v39 = vsub.f32 %v1425_v36, %v1430_v38 }
 0xdcd   : > { %v1432_v40 = vmul.f32 %v1877_v13, %v1431_v39  ;;  %v1692_v13 = vld [vmem:[%s2623_s17] ss:$0 sm:$0xff] }
 0xdcf   : > { %v1433_v41 = vmul.f32 %v1432_v40, %v1432_v40 }
 0xdd1   : > { %1434 = vadd.xlane.f32.xlu2 %v1433_v41 }
 0xe44   : > { %v1435_v42 = vpop.xlane.xlu2 %1434 }
 0xe45   : > { %v1436_v43 = vmul.f32 0.03125, %v1435_v42 }
 0xe47   : > { %v1437_v44 = vadd.f32 1e-08, %v1436_v43 }
 0xe49   : > { %1718 = vrsqrt.f32 %v1437_v44  ;;  %vm1444_vm5 = vweird.f32 %v1437_v44 }
 0xe4f   : > { %v1719_v45 = vpop.eup %1718 }
 0xe50   : > { %v1439_v46 = vmul.f32 %v1719_v45, %v1437_v44  ;;  %vm1445_vm4 = vweird.f32 %v1719_v45 }
 0xe51   : > { %vm1446_vm6 = vmor %vm1444_vm5, %vm1445_vm4 }
 0xe52   : > { %v1440_v47 = vmul.f32 %v1719_v45, %v1439_v46 }
 0xe54   : > { %v1441_v48 = vmul.f32 0.5, %v1440_v47 }
 0xe56   : > { %v1442_v49 = vsub.f32 1.5, %v1441_v48 }
 0xe58   : > { %v1443_v4 = vmul.f32 %v1719_v45, %v1442_v49 }
 0xe5a   : > { %v1447_v50 = vsel %vm1446_vm6, %v1719_v45, %v1443_v4 }
 0xe5b   : > { %v1448_v51 = vmul.f32 %v1447_v50, %v1432_v40 }
 0xe5d   : > { %v1452_v53 = vmul.f32 %v1692_v13, %v1448_v51 }
 0xe5f   : > { %v1456_v55 = vadd.f32 %v1693_v52, %v1452_v53 }
 0xe61   : > { %v1460_v57 = vmul.f32 %v1458_v54, %v1456_v55  ;;  %v1459_v58 = vmul.f32 %v1457_v0, %v1456_v55 }
 0xe63   : > { %1463 = vadd.xlane.f32.xlu0 %v1460_v57  ;;  %1461 = vadd.xlane.f32.xlu1 %v1459_v58 }
 0xed6   : > { %v1464_v62 = vpop.xlane.xlu0 %1463  ;;  %v1462_v59 = vpop.xlane.xlu1 %1461 }
 0xed7   : > { %v1468_v3 = vperm.slane %v1464_v62, %v1871_v9  ;;  %v1467_v60 = vperm.slane %v1462_v59, %v1871_v9 }
 0xed9   : > { %v1470_v61 = vsel %vm1469_vm7, %v1468_v3, %v1467_v60 }
 0xeda   : > { %1473 = vst.msk [vmem:[%s634_s24] sm:$0x3] %vm1472_vm8, %v1470_v61 }
 0xedb PF: > { %s29_s0 = sadd.s32 1, %s1726_s0  }
 0xedc   : > { %p26_p4 = scmp.ge.s32.totalorder %s29_s0, 4  }
 0xede   :  { %28 = sbr.rel (!%p26_p4) target bundleno = 5 (0x5), region = 138 }

</bundles_post_ra>
